<compile_context>
chip_gen: v7x
topology: tpu7x:2x2x1
jax: 0.10.0
libtpu: 0.0.40
codegen_flags: <defaults>
</compile_context>

<pallas_src>
import functools
import math

import jax
import jax.numpy as jnp
from jax import lax
from jax.experimental import pallas as pl
from jax.experimental.pallas import tpu as pltpu


# ---------------------------------------------------------------------------
# in-kernel helpers
# ---------------------------------------------------------------------------
def _layernorm(x, gamma, beta, eps=1e-5):
    # fused statistics: E[x] and E[x^2] in one elementwise pass, var = E[x^2]-mean^2
    mean = jnp.mean(x, axis=-1, keepdims=True)
    mean_sq = jnp.mean(x * x, axis=-1, keepdims=True)
    var = mean_sq - mean * mean
    return (x - mean) * lax.rsqrt(var + eps) * gamma + beta


def _gelu_exact(x):
    # exact (erf) GELU — used only by the pure-JAX reference (matches torch default)
    return 0.5 * x * (1.0 + lax.erf(x * (1.0 / math.sqrt(2.0))))


# ---------------------------------------------------------------------------
# fused per-layer kernel:
#   Residual(PreNorm(Attention)) followed by Residual(PreNorm(FeedForward))
#   One row-block of `bt` whole (padded) batch elements per grid step.
# ---------------------------------------------------------------------------
def layer_kernel(x_ref, ln1g_ref, ln1b_ref, wqkv_ref, wo_ref, bo_ref,
                 ln2g_ref, ln2b_ref, w1_ref, b1_ref, w2_ref, b2_ref,
                 o_ref, *, heads, seq_pad, seq_actual, scale):
    rows, dim = x_ref.shape
    bt = rows // seq_pad
    d = dim // heads

    x = x_ref[...].astype(jnp.float32)                          # (rows, dim) f32

    # ---------------- attention sub-block ----------------
    xn = _layernorm(x, ln1g_ref[...], ln1b_ref[...])
    xn_b = xn.astype(jnp.bfloat16)
    qkv = jnp.dot(xn_b, wqkv_ref[...],
                  preferred_element_type=jnp.float32)            # (rows, 3*dim) f32

    q = (qkv[:, 0 * dim:1 * dim] * scale).astype(jnp.bfloat16)   # scale folded into q
    k = qkv[:, 1 * dim:2 * dim].astype(jnp.bfloat16)
    v = qkv[:, 2 * dim:3 * dim].astype(jnp.bfloat16)

    if seq_pad != seq_actual:
        # mask padded key columns (sequence was padded in the wrapper)
        col = lax.broadcasted_iota(jnp.int32, (1, 1, seq_pad), 2)
        key_mask = col < seq_actual
    else:
        key_mask = None

    head_outs = []
    for h in range(heads):                                       # static, small
        qh = q[:, h * d:(h + 1) * d].reshape(bt, seq_pad, d)     # (bt, n, d)
        kh = k[:, h * d:(h + 1) * d].reshape(bt, seq_pad, d)
        vh = v[:, h * d:(h + 1) * d].reshape(bt, seq_pad, d)
        dots = jnp.einsum('bnd,bmd->bnm', qh, kh,
                          preferred_element_type=jnp.float32)    # (bt, n, n) f32
        if key_mask is not None:
            dots = jnp.where(key_mask, dots, jnp.float32(-1e30))
        dots = dots - jnp.max(dots, axis=-1, keepdims=True)
        e = jnp.exp(dots)
        p = e * pl.reciprocal(jnp.sum(e, axis=-1, keepdims=True), approx=True)
        head_outs.append(jnp.einsum('bnm,bmd->bnd', p.astype(jnp.bfloat16), vh,
                                    preferred_element_type=jnp.float32))
    # TODO(synk): folding heads into the dot_general batch dims would remove the
    # per-head lane slices / concat relayouts, but needs a rank-4
    # (b,n,h,d)->(b,h,n,d) transpose inside the kernel (Mosaic-lowering risk);
    # the K=D/3D/mlp dense matmuls dominate at real ViT sizes, so kept as-is.
    attn_out = jnp.concatenate(head_outs, axis=-1)               # 'b n (h d)'
    attn_out = attn_out.reshape(rows, dim).astype(jnp.bfloat16)

    proj = jnp.dot(attn_out, wo_ref[...],
                   preferred_element_type=jnp.float32) + bo_ref[...]
    x = x + proj                                                  # residual 1 (f32)

    # ---------------- feed-forward sub-block ----------------
    yn = _layernorm(x, ln2g_ref[...], ln2b_ref[...]).astype(jnp.bfloat16)
    h1 = jnp.dot(yn, w1_ref[...],
                 preferred_element_type=jnp.float32) + b1_ref[...]
    # tanh-approx GELU in bf16: transcendental routes to the EUP slot and halves
    # vreg pressure on v6e/v7x; the delta vs exact erf GELU is well below the
    # bf16 matmul error already accepted (5e-2 tolerance).
    h1 = jax.nn.gelu(h1.astype(jnp.bfloat16), approximate=True)
    y = jnp.dot(h1, w2_ref[...],
                preferred_element_type=jnp.float32) + b2_ref[...]
    x = x + y                                                     # residual 2 (f32)

    o_ref[...] = x.astype(o_ref.dtype)


# ---------------------------------------------------------------------------
# generation-specific configuration
# ---------------------------------------------------------------------------
def _hw_config():
    try:
        vmem = pltpu.get_tpu_info().vmem_capacity_bytes
    except Exception:
        vmem = 128 * 1024 * 1024
    if vmem <= 96 * 1024 * 1024:
        # v7x: 64 MiB VMEM per TC — smaller row blocks, 48 MiB scoped limit
        return dict(vmem_limit=48 * 1024 * 1024, target_rows=256)
    # v5e / v6e: 128 MiB VMEM — bigger row blocks, raise scoped limit
    return dict(vmem_limit=96 * 1024 * 1024, target_rows=512)


def _pick_block_batch(B, seq_pad, target_rows):
    """Largest divisor bt of B with bt*seq_pad <= target_rows.  Never the whole
    batch in one block when B > 1 (keeps >= 2 grid steps for megacore sharding)."""
    cap = max(1, target_rows // max(seq_pad, 1))
    if B > 1:
        cap = min(cap, B // 2)
    bt = 1
    for cand in range(1, min(B, cap) + 1):
        if B % cand == 0:
            bt = cand
    return bt


# ---------------------------------------------------------------------------
# wrapper around pallas_call (one fused call per layer)
# ---------------------------------------------------------------------------
def transformer_layer(x2, p, *, heads, batch, seq_pad, seq_actual, block_batch,
                      vmem_limit):
    BN, D = x2.shape
    H = p["w1"].shape[1]
    rows = block_batch * seq_pad
    grid = (batch // block_batch,)
    scale = float(D) ** (-0.5)        # dim**-0.5, exactly as in the reference module

    kern = functools.partial(layer_kernel, heads=heads, seq_pad=seq_pad,
                             seq_actual=seq_actual, scale=scale)

    const = lambda i: (0, 0)
    # grid-invariant params: constant index map + single buffer (no pipelining needed)
    wspec = lambda shape: pl.BlockSpec(shape, const, pipeline_mode=pl.Buffered(1))

    dense_flops = 2 * BN * D * (3 * D + D + 2 * H)
    attn_flops = 4 * BN * seq_pad * D
    weight_bytes = 2 * (3 * D * D + D * D + 2 * D * H)            # bf16
    cost = pl.CostEstimate(
        flops=dense_flops + attn_flops,
        transcendentals=BN * (H + seq_pad * heads),
        bytes_accessed=2 * BN * D * 4 + weight_bytes,
    )

    return pl.pallas_call(
        kern,
        out_shape=jax.ShapeDtypeStruct((BN, D), x2.dtype),
        grid=grid,
        in_specs=[
            pl.BlockSpec((rows, D), lambda i: (i, 0)),   # x rows (bt batch elems)
            wspec((1, D)),                               # ln1 gamma
            wspec((1, D)),                               # ln1 beta
            wspec((D, 3 * D)),                           # W_qkv (bf16)
            wspec((D, D)),                               # W_out (bf16)
            wspec((1, D)),                               # b_out
            wspec((1, D)),                               # ln2 gamma
            wspec((1, D)),                               # ln2 beta
            wspec((D, H)),                               # W1 (bf16)
            wspec((1, H)),                               # b1
            wspec((H, D)),                               # W2 (bf16)
            wspec((1, D)),                               # b2
        ],
        out_specs=pl.BlockSpec((rows, D), lambda i: (i, 0)),
        compiler_params=pltpu.CompilerParams(
            dimension_semantics=("parallel",),           # shard row-blocks across TCs
            vmem_limit_bytes=vmem_limit,
        ),
        cost_estimate=cost,
    )(x2, p["ln1_g"], p["ln1_b"], p["wqkv"], p["wo"], p["bo"],
      p["ln2_g"], p["ln2_b"], p["w1"], p["b1"], p["w2"], p["b2"])


def transformer_forward(x, layers, *, heads, log_weights=False):
    # matches Transformer.forward(x, mask=None, attn_mask=None)
    B, N, D = x.shape
    seq_pad = ((N + 7) // 8) * 8          # sublane-align sequence; padded key columns
    if seq_pad != N:                      # are masked to -inf inside the kernel
        x = jnp.pad(x, ((0, 0), (0, seq_pad - N), (0, 0)))
    cfg = _hw_config()
    bt = _pick_block_batch(B, seq_pad, cfg["target_rows"])
    x2 = x.reshape(B * seq_pad, D)
    attn_values = []
    for p in layers:
        x2 = transformer_layer(x2, p, heads=heads, batch=B, seq_pad=seq_pad,
                               seq_actual=N, block_batch=bt,
                               vmem_limit=cfg["vmem_limit"])
        # TODO(synk): log_weights=True would need the per-head softmax maps as an
        # extra kernel output; not emitted for log_weights=False.
    out = x2.reshape(B, seq_pad, D)[:, :N, :]
    return out, attn_values


# ---------------------------------------------------------------------------
# parameter init (mirrors the PyTorch module's _init_weights in shape / std)
# ---------------------------------------------------------------------------
def _get_std(init_scale, torch_weight_shape):
    # torch nn.Linear weight shape is (out_features, in_features); replicate the
    # reference's naming: in_d, out_d = tensor.shape
    in_d, out_d = torch_weight_shape
    return (2.0 / (in_d + init_scale * out_d)) ** 0.5


def init_transformer_params(key, dim, depth, heads, mlp_dim, init_scale):
    layers = []
    for _ in range(depth):
        key, k_qkv, k_o, k_1, k_2 = jax.random.split(key, 5)
        # stored as (in, out) = transpose of torch layout; dense weights in bf16
        wqkv = (jax.random.normal(k_qkv, (dim, 3 * dim), jnp.float32)
                * _get_std(init_scale, (3 * dim, dim))).astype(jnp.bfloat16)
        wo = (jax.random.normal(k_o, (dim, dim), jnp.float32)
              * _get_std(init_scale, (dim, dim))).astype(jnp.bfloat16)
        w1 = (jax.random.normal(k_1, (dim, mlp_dim), jnp.float32)
              * _get_std(init_scale, (mlp_dim, dim))).astype(jnp.bfloat16)
        w2 = (jax.random.normal(k_2, (mlp_dim, dim), jnp.float32)
              * _get_std(init_scale, (dim, mlp_dim))).astype(jnp.bfloat16)
        layers.append(dict(
            ln1_g=jnp.ones((1, dim), jnp.float32), ln1_b=jnp.zeros((1, dim), jnp.float32),
            wqkv=wqkv, wo=wo, bo=jnp.zeros((1, dim), jnp.float32),
            ln2_g=jnp.ones((1, dim), jnp.float32), ln2_b=jnp.zeros((1, dim), jnp.float32),
            w1=w1, b1=jnp.zeros((1, mlp_dim), jnp.float32),
            w2=w2, b2=jnp.zeros((1, dim), jnp.float32),
        ))
    return layers


# ---------------------------------------------------------------------------
# pure-JAX reference (f32, exact-erf GELU) for a correctness check
# ---------------------------------------------------------------------------
def _reference_forward(x, layers, heads):
    for p in layers:
        B, N, D = x.shape
        d = D // heads
        xn = _layernorm(x, p["ln1_g"], p["ln1_b"])
        qkv = xn @ p["wqkv"].astype(jnp.float32)
        q, k, v = jnp.split(qkv, 3, axis=-1)
        sh = lambda t: t.reshape(B, N, heads, d).transpose(0, 2, 1, 3)
        q, k, v = sh(q), sh(k), sh(v)
        dots = jnp.einsum('bhid,bhjd->bhij', q, k) * (float(D) ** -0.5)
        attn = jax.nn.softmax(dots, axis=-1)
        out = jnp.einsum('bhij,bhjd->bhid', attn, v)
        out = out.transpose(0, 2, 1, 3).reshape(B, N, D)
        out = out @ p["wo"].astype(jnp.float32) + p["bo"]
        x = x + out
        yn = _layernorm(x, p["ln2_g"], p["ln2_b"])
        h = yn @ p["w1"].astype(jnp.float32) + p["b1"]
        h = _gelu_exact(h)
        y = h @ p["w2"].astype(jnp.float32) + p["b2"]
        x = x + y
    return x


# ---------------------------------------------------------------------------
if __name__ == "__main__":
    dim, depth, heads, mlp_dim = 32, 2, 4, 64
    dropout, init_scale = 0.0, 4
    B, N = 2, 8

    key = jax.random.PRNGKey(0)
    key, kx = jax.random.split(key)
    x = jax.random.normal(kx, (B, N, dim), jnp.float32)

    params = init_transformer_params(key, dim, depth, heads, mlp_dim, init_scale)

    out, attn_values = transformer_forward(x, params, heads=heads)
    out = jax.block_until_ready(out)

    assert out.shape == (B, N, dim)
    assert bool(jnp.all(jnp.isfinite(out)))

    # loose tolerance: bf16 matmul inputs, approximate reciprocal, tanh-approx GELU
    ref = _reference_forward(x, params, heads)
    assert bool(jnp.allclose(out, ref, atol=5e-2, rtol=5e-2)), "mismatch vs reference"

    print("KERNEL_OK")
</pallas_src>

<mosaic_0001>
module attributes {stable_mosaic.version = 11 : i64} {
  func.func @layer_kernel(%arg0: i32, %arg1: memref<8x32xf32, #tpu.memory_space<vmem>>, %arg2: memref<1x32xf32, #tpu.memory_space<vmem>>, %arg3: memref<1x32xf32, #tpu.memory_space<vmem>>, %arg4: memref<32x96xbf16, #tpu.memory_space<vmem>>, %arg5: memref<32x32xbf16, #tpu.memory_space<vmem>>, %arg6: memref<1x32xf32, #tpu.memory_space<vmem>>, %arg7: memref<1x32xf32, #tpu.memory_space<vmem>>, %arg8: memref<1x32xf32, #tpu.memory_space<vmem>>, %arg9: memref<32x64xbf16, #tpu.memory_space<vmem>>, %arg10: memref<1x64xf32, #tpu.memory_space<vmem>>, %arg11: memref<64x32xbf16, #tpu.memory_space<vmem>>, %arg12: memref<1x32xf32, #tpu.memory_space<vmem>>, %arg13: memref<8x32xf32, #tpu.memory_space<vmem>>) attributes {dimension_semantics = [#tpu.dimension_semantics<parallel>], iteration_bounds = array<i64: 2>, scalar_prefetch = 0 : i64, scratch_operands = 0 : i64, tpu.core_type = #tpu.core_type<tc>, window_params = [{transform_indices = @transform_0, window_bounds = array<i64: 8, 32>}, {pipeline_mode = #tpu.pipeline_mode<synchronous>, transform_indices = @transform_1, window_bounds = array<i64: 1, 32>}, {pipeline_mode = #tpu.pipeline_mode<synchronous>, transform_indices = @transform_2, window_bounds = array<i64: 1, 32>}, {pipeline_mode = #tpu.pipeline_mode<synchronous>, transform_indices = @transform_3, window_bounds = array<i64: 32, 96>}, {pipeline_mode = #tpu.pipeline_mode<synchronous>, transform_indices = @transform_4, window_bounds = array<i64: 32, 32>}, {pipeline_mode = #tpu.pipeline_mode<synchronous>, transform_indices = @transform_5, window_bounds = array<i64: 1, 32>}, {pipeline_mode = #tpu.pipeline_mode<synchronous>, transform_indices = @transform_6, window_bounds = array<i64: 1, 32>}, {pipeline_mode = #tpu.pipeline_mode<synchronous>, transform_indices = @transform_7, window_bounds = array<i64: 1, 32>}, {pipeline_mode = #tpu.pipeline_mode<synchronous>, transform_indices = @transform_8, window_bounds = array<i64: 32, 64>}, {pipeline_mode = #tpu.pipeline_mode<synchronous>, transform_indices = @transform_9, window_bounds = array<i64: 1, 64>}, {pipeline_mode = #tpu.pipeline_mode<synchronous>, transform_indices = @transform_10, window_bounds = array<i64: 64, 32>}, {pipeline_mode = #tpu.pipeline_mode<synchronous>, transform_indices = @transform_11, window_bounds = array<i64: 1, 32>}, {transform_indices = @transform_12, window_bounds = array<i64: 8, 32>}]} {
    %c0 = arith.constant 0 : index
    %c0_0 = arith.constant 0 : index
    %0 = vector.load %arg1[%c0, %c0_0] : memref<8x32xf32, #tpu.memory_space<vmem>>, vector<8x32xf32>
    %c0_1 = arith.constant 0 : index
    %c0_2 = arith.constant 0 : index
    %1 = vector.load %arg2[%c0_1, %c0_2] : memref<1x32xf32, #tpu.memory_space<vmem>>, vector<1x32xf32>
    %c0_3 = arith.constant 0 : index
    %c0_4 = arith.constant 0 : index
    %2 = vector.load %arg3[%c0_3, %c0_4] : memref<1x32xf32, #tpu.memory_space<vmem>>, vector<1x32xf32>
    %cst = arith.constant dense<0.000000e+00> : vector<8xf32>
    %3 = vector.multi_reduction <add>, %0, %cst [1] : vector<8x32xf32> to vector<8xf32>
    %4 = vector.shape_cast %3 : vector<8xf32> to vector<8x1xf32>
    %cst_5 = arith.constant 3.200000e+01 : f32
    %5 = vector.broadcast %cst_5 : f32 to vector<8x1xf32>
    %6 = arith.divf %4, %5 : vector<8x1xf32>
    %7 = arith.mulf %0, %0 : vector<8x32xf32>
    %cst_6 = arith.constant dense<0.000000e+00> : vector<8xf32>
    %8 = vector.multi_reduction <add>, %7, %cst_6 [1] : vector<8x32xf32> to vector<8xf32>
    %9 = vector.shape_cast %8 : vector<8xf32> to vector<8x1xf32>
    %cst_7 = arith.constant 3.200000e+01 : f32
    %10 = vector.broadcast %cst_7 : f32 to vector<8x1xf32>
    %11 = arith.divf %9, %10 : vector<8x1xf32>
    %12 = arith.mulf %6, %6 : vector<8x1xf32>
    %13 = arith.subf %11, %12 : vector<8x1xf32>
    %14 = vector.broadcast %6 : vector<8x1xf32> to vector<8x32xf32>
    %15 = arith.subf %0, %14 : vector<8x32xf32>
    %cst_8 = arith.constant 9.99999974E-6 : f32
    %16 = vector.broadcast %cst_8 : f32 to vector<8x1xf32>
    %17 = arith.addf %13, %16 : vector<8x1xf32>
    %18 = math.rsqrt %17 : vector<8x1xf32>
    %19 = vector.broadcast %18 : vector<8x1xf32> to vector<8x32xf32>
    %20 = arith.mulf %15, %19 : vector<8x32xf32>
    %21 = vector.broadcast %1 : vector<1x32xf32> to vector<8x32xf32>
    %22 = arith.mulf %20, %21 : vector<8x32xf32>
    %23 = vector.broadcast %2 : vector<1x32xf32> to vector<8x32xf32>
    %24 = arith.addf %22, %23 : vector<8x32xf32>
    %25 = arith.truncf %24 : vector<8x32xf32> to vector<8x32xbf16>
    %c0_9 = arith.constant 0 : index
    %c0_10 = arith.constant 0 : index
    %26 = vector.load %arg4[%c0_9, %c0_10] : memref<32x96xbf16, #tpu.memory_space<vmem>>, vector<32x96xbf16>
    %cst_11 = arith.constant dense<0.000000e+00> : vector<8x96xf32>
    %27 = tpu.matmul %25, %26, %cst_11 {dimension_numbers = #tpu.dot_dimension_numbers<[1], [0], [0], [1], [0, 0, 1, 1], [], []>} : vector<8x32xbf16>, vector<32x96xbf16>, vector<8x96xf32> -> vector<8x96xf32>
    %28 = vector.extract_strided_slice %27 {offsets = [0, 0], sizes = [8, 32], strides = [1, 1]} : vector<8x96xf32> to vector<8x32xf32>
    %cst_12 = arith.constant 0.176776692 : f32
    %29 = vector.broadcast %cst_12 : f32 to vector<8x32xf32>
    %30 = arith.mulf %28, %29 : vector<8x32xf32>
    %31 = arith.truncf %30 : vector<8x32xf32> to vector<8x32xbf16>
    %32 = vector.extract_strided_slice %27 {offsets = [0, 32], sizes = [8, 32], strides = [1, 1]} : vector<8x96xf32> to vector<8x32xf32>
    %33 = arith.truncf %32 : vector<8x32xf32> to vector<8x32xbf16>
    %34 = vector.extract_strided_slice %27 {offsets = [0, 64], sizes = [8, 32], strides = [1, 1]} : vector<8x96xf32> to vector<8x32xf32>
    %35 = arith.truncf %34 : vector<8x32xf32> to vector<8x32xbf16>
    %36 = vector.extract_strided_slice %31 {offsets = [0, 0], sizes = [8, 8], strides = [1, 1]} : vector<8x32xbf16> to vector<8x8xbf16>
    %37 = vector.shape_cast %36 : vector<8x8xbf16> to vector<1x8x8xbf16>
    %38 = vector.extract_strided_slice %33 {offsets = [0, 0], sizes = [8, 8], strides = [1, 1]} : vector<8x32xbf16> to vector<8x8xbf16>
    %39 = vector.shape_cast %38 : vector<8x8xbf16> to vector<1x8x8xbf16>
    %40 = vector.extract_strided_slice %35 {offsets = [0, 0], sizes = [8, 8], strides = [1, 1]} : vector<8x32xbf16> to vector<8x8xbf16>
    %41 = vector.shape_cast %40 : vector<8x8xbf16> to vector<1x8x8xbf16>
    "tpu.trace_start"() <{level = 10 : i32, message = "bnd,bmd->bnm"}> : () -> ()
    %cst_13 = arith.constant dense<0.000000e+00> : vector<1x8x8xf32>
    %42 = tpu.matmul %37, %39, %cst_13 {dimension_numbers = #tpu.dot_dimension_numbers<[2], [2], [1], [1], [0, 0, 0, 1, 1, 1], [0], [0]>} : vector<1x8x8xbf16>, vector<1x8x8xbf16>, vector<1x8x8xf32> -> vector<1x8x8xf32>
    "tpu.trace_stop"() : () -> ()
    %cst_14 = arith.constant dense<0xFF800000> : vector<1x8xf32>
    %43 = vector.multi_reduction <maximumf>, %42, %cst_14 [2] : vector<1x8x8xf32> to vector<1x8xf32>
    %44 = vector.shape_cast %43 : vector<1x8xf32> to vector<1x8x1xf32>
    %45 = vector.broadcast %44 : vector<1x8x1xf32> to vector<1x8x8xf32>
    %46 = arith.subf %42, %45 : vector<1x8x8xf32>
    %47 = math.exp %46 : vector<1x8x8xf32>
    %cst_15 = arith.constant dense<0.000000e+00> : vector<1x8xf32>
    %48 = vector.multi_reduction <add>, %47, %cst_15 [2] : vector<1x8x8xf32> to vector<1x8xf32>
    %49 = vector.shape_cast %48 : vector<1x8xf32> to vector<1x8x1xf32>
    %50 = tpu.reciprocal %49 {approx = true} : vector<1x8x1xf32> -> vector<1x8x1xf32>
    %51 = vector.broadcast %50 : vector<1x8x1xf32> to vector<1x8x8xf32>
    %52 = arith.mulf %47, %51 : vector<1x8x8xf32>
    %53 = arith.truncf %52 : vector<1x8x8xf32> to vector<1x8x8xbf16>
    "tpu.trace_start"() <{level = 10 : i32, message = "bnm,bmd->bnd"}> : () -> ()
    %cst_16 = arith.constant dense<0.000000e+00> : vector<1x8x8xf32>
    %54 = tpu.matmul %53, %41, %cst_16 {dimension_numbers = #tpu.dot_dimension_numbers<[2], [1], [1], [2], [0, 0, 0, 1, 1, 2], [0], [0]>} : vector<1x8x8xbf16>, vector<1x8x8xbf16>, vector<1x8x8xf32> -> vector<1x8x8xf32>
    "tpu.trace_stop"() : () -> ()
    %55 = vector.extract_strided_slice %31 {offsets = [0, 8], sizes = [8, 8], strides = [1, 1]} : vector<8x32xbf16> to vector<8x8xbf16>
    %56 = vector.shape_cast %55 : vector<8x8xbf16> to vector<1x8x8xbf16>
    %57 = vector.extract_strided_slice %33 {offsets = [0, 8], sizes = [8, 8], strides = [1, 1]} : vector<8x32xbf16> to vector<8x8xbf16>
    %58 = vector.shape_cast %57 : vector<8x8xbf16> to vector<1x8x8xbf16>
    %59 = vector.extract_strided_slice %35 {offsets = [0, 8], sizes = [8, 8], strides = [1, 1]} : vector<8x32xbf16> to vector<8x8xbf16>
    %60 = vector.shape_cast %59 : vector<8x8xbf16> to vector<1x8x8xbf16>
    "tpu.trace_start"() <{level = 10 : i32, message = "bnd,bmd->bnm"}> : () -> ()
    %cst_17 = arith.constant dense<0.000000e+00> : vector<1x8x8xf32>
    %61 = tpu.matmul %56, %58, %cst_17 {dimension_numbers = #tpu.dot_dimension_numbers<[2], [2], [1], [1], [0, 0, 0, 1, 1, 1], [0], [0]>} : vector<1x8x8xbf16>, vector<1x8x8xbf16>, vector<1x8x8xf32> -> vector<1x8x8xf32>
    "tpu.trace_stop"() : () -> ()
    %cst_18 = arith.constant dense<0xFF800000> : vector<1x8xf32>
    %62 = vector.multi_reduction <maximumf>, %61, %cst_18 [2] : vector<1x8x8xf32> to vector<1x8xf32>
    %63 = vector.shape_cast %62 : vector<1x8xf32> to vector<1x8x1xf32>
    %64 = vector.broadcast %63 : vector<1x8x1xf32> to vector<1x8x8xf32>
    %65 = arith.subf %61, %64 : vector<1x8x8xf32>
    %66 = math.exp %65 : vector<1x8x8xf32>
    %cst_19 = arith.constant dense<0.000000e+00> : vector<1x8xf32>
    %67 = vector.multi_reduction <add>, %66, %cst_19 [2] : vector<1x8x8xf32> to vector<1x8xf32>
    %68 = vector.shape_cast %67 : vector<1x8xf32> to vector<1x8x1xf32>
    %69 = tpu.reciprocal %68 {approx = true} : vector<1x8x1xf32> -> vector<1x8x1xf32>
    %70 = vector.broadcast %69 : vector<1x8x1xf32> to vector<1x8x8xf32>
    %71 = arith.mulf %66, %70 : vector<1x8x8xf32>
    %72 = arith.truncf %71 : vector<1x8x8xf32> to vector<1x8x8xbf16>
    "tpu.trace_start"() <{level = 10 : i32, message = "bnm,bmd->bnd"}> : () -> ()
    %cst_20 = arith.constant dense<0.000000e+00> : vector<1x8x8xf32>
    %73 = tpu.matmul %72, %60, %cst_20 {dimension_numbers = #tpu.dot_dimension_numbers<[2], [1], [1], [2], [0, 0, 0, 1, 1, 2], [0], [0]>} : vector<1x8x8xbf16>, vector<1x8x8xbf16>, vector<1x8x8xf32> -> vector<1x8x8xf32>
    "tpu.trace_stop"() : () -> ()
    %74 = vector.extract_strided_slice %31 {offsets = [0, 16], sizes = [8, 8], strides = [1, 1]} : vector<8x32xbf16> to vector<8x8xbf16>
    %75 = vector.shape_cast %74 : vector<8x8xbf16> to vector<1x8x8xbf16>
    %76 = vector.extract_strided_slice %33 {offsets = [0, 16], sizes = [8, 8], strides = [1, 1]} : vector<8x32xbf16> to vector<8x8xbf16>
    %77 = vector.shape_cast %76 : vector<8x8xbf16> to vector<1x8x8xbf16>
    %78 = vector.extract_strided_slice %35 {offsets = [0, 16], sizes = [8, 8], strides = [1, 1]} : vector<8x32xbf16> to vector<8x8xbf16>
    %79 = vector.shape_cast %78 : vector<8x8xbf16> to vector<1x8x8xbf16>
    "tpu.trace_start"() <{level = 10 : i32, message = "bnd,bmd->bnm"}> : () -> ()
    %cst_21 = arith.constant dense<0.000000e+00> : vector<1x8x8xf32>
    %80 = tpu.matmul %75, %77, %cst_21 {dimension_numbers = #tpu.dot_dimension_numbers<[2], [2], [1], [1], [0, 0, 0, 1, 1, 1], [0], [0]>} : vector<1x8x8xbf16>, vector<1x8x8xbf16>, vector<1x8x8xf32> -> vector<1x8x8xf32>
    "tpu.trace_stop"() : () -> ()
    %cst_22 = arith.constant dense<0xFF800000> : vector<1x8xf32>
    %81 = vector.multi_reduction <maximumf>, %80, %cst_22 [2] : vector<1x8x8xf32> to vector<1x8xf32>
    %82 = vector.shape_cast %81 : vector<1x8xf32> to vector<1x8x1xf32>
    %83 = vector.broadcast %82 : vector<1x8x1xf32> to vector<1x8x8xf32>
    %84 = arith.subf %80, %83 : vector<1x8x8xf32>
    %85 = math.exp %84 : vector<1x8x8xf32>
    %cst_23 = arith.constant dense<0.000000e+00> : vector<1x8xf32>
    %86 = vector.multi_reduction <add>, %85, %cst_23 [2] : vector<1x8x8xf32> to vector<1x8xf32>
    %87 = vector.shape_cast %86 : vector<1x8xf32> to vector<1x8x1xf32>
    %88 = tpu.reciprocal %87 {approx = true} : vector<1x8x1xf32> -> vector<1x8x1xf32>
    %89 = vector.broadcast %88 : vector<1x8x1xf32> to vector<1x8x8xf32>
    %90 = arith.mulf %85, %89 : vector<1x8x8xf32>
    %91 = arith.truncf %90 : vector<1x8x8xf32> to vector<1x8x8xbf16>
    "tpu.trace_start"() <{level = 10 : i32, message = "bnm,bmd->bnd"}> : () -> ()
    %cst_24 = arith.constant dense<0.000000e+00> : vector<1x8x8xf32>
    %92 = tpu.matmul %91, %79, %cst_24 {dimension_numbers = #tpu.dot_dimension_numbers<[2], [1], [1], [2], [0, 0, 0, 1, 1, 2], [0], [0]>} : vector<1x8x8xbf16>, vector<1x8x8xbf16>, vector<1x8x8xf32> -> vector<1x8x8xf32>
    "tpu.trace_stop"() : () -> ()
    %93 = vector.extract_strided_slice %31 {offsets = [0, 24], sizes = [8, 8], strides = [1, 1]} : vector<8x32xbf16> to vector<8x8xbf16>
    %94 = vector.shape_cast %93 : vector<8x8xbf16> to vector<1x8x8xbf16>
    %95 = vector.extract_strided_slice %33 {offsets = [0, 24], sizes = [8, 8], strides = [1, 1]} : vector<8x32xbf16> to vector<8x8xbf16>
    %96 = vector.shape_cast %95 : vector<8x8xbf16> to vector<1x8x8xbf16>
    %97 = vector.extract_strided_slice %35 {offsets = [0, 24], sizes = [8, 8], strides = [1, 1]} : vector<8x32xbf16> to vector<8x8xbf16>
    %98 = vector.shape_cast %97 : vector<8x8xbf16> to vector<1x8x8xbf16>
    "tpu.trace_start"() <{level = 10 : i32, message = "bnd,bmd->bnm"}> : () -> ()
    %cst_25 = arith.constant dense<0.000000e+00> : vector<1x8x8xf32>
    %99 = tpu.matmul %94, %96, %cst_25 {dimension_numbers = #tpu.dot_dimension_numbers<[2], [2], [1], [1], [0, 0, 0, 1, 1, 1], [0], [0]>} : vector<1x8x8xbf16>, vector<1x8x8xbf16>, vector<1x8x8xf32> -> vector<1x8x8xf32>
    "tpu.trace_stop"() : () -> ()
    %cst_26 = arith.constant dense<0xFF800000> : vector<1x8xf32>
    %100 = vector.multi_reduction <maximumf>, %99, %cst_26 [2] : vector<1x8x8xf32> to vector<1x8xf32>
    %101 = vector.shape_cast %100 : vector<1x8xf32> to vector<1x8x1xf32>
    %102 = vector.broadcast %101 : vector<1x8x1xf32> to vector<1x8x8xf32>
    %103 = arith.subf %99, %102 : vector<1x8x8xf32>
    %104 = math.exp %103 : vector<1x8x8xf32>
    %cst_27 = arith.constant dense<0.000000e+00> : vector<1x8xf32>
    %105 = vector.multi_reduction <add>, %104, %cst_27 [2] : vector<1x8x8xf32> to vector<1x8xf32>
    %106 = vector.shape_cast %105 : vector<1x8xf32> to vector<1x8x1xf32>
    %107 = tpu.reciprocal %106 {approx = true} : vector<1x8x1xf32> -> vector<1x8x1xf32>
    %108 = vector.broadcast %107 : vector<1x8x1xf32> to vector<1x8x8xf32>
    %109 = arith.mulf %104, %108 : vector<1x8x8xf32>
    %110 = arith.truncf %109 : vector<1x8x8xf32> to vector<1x8x8xbf16>
    "tpu.trace_start"() <{level = 10 : i32, message = "bnm,bmd->bnd"}> : () -> ()
    %cst_28 = arith.constant dense<0.000000e+00> : vector<1x8x8xf32>
    %111 = tpu.matmul %110, %98, %cst_28 {dimension_numbers = #tpu.dot_dimension_numbers<[2], [1], [1], [2], [0, 0, 0, 1, 1, 2], [0], [0]>} : vector<1x8x8xbf16>, vector<1x8x8xbf16>, vector<1x8x8xf32> -> vector<1x8x8xf32>
    "tpu.trace_stop"() : () -> ()
    %112 = tpu.concatenate %54, %73, %92, %111 in 2 : vector<1x8x8xf32>, vector<1x8x8xf32>, vector<1x8x8xf32>, vector<1x8x8xf32> -> vector<1x8x32xf32>
    %113 = vector.shape_cast %112 : vector<1x8x32xf32> to vector<8x32xf32>
    %114 = arith.truncf %113 : vector<8x32xf32> to vector<8x32xbf16>
    %c0_29 = arith.constant 0 : index
    %c0_30 = arith.constant 0 : index
    %115 = vector.load %arg5[%c0_29, %c0_30] : memref<32x32xbf16, #tpu.memory_space<vmem>>, vector<32x32xbf16>
    %cst_31 = arith.constant dense<0.000000e+00> : vector<8x32xf32>
    %116 = tpu.matmul %114, %115, %cst_31 {dimension_numbers = #tpu.dot_dimension_numbers<[1], [0], [0], [1], [0, 0, 1, 1], [], []>} : vector<8x32xbf16>, vector<32x32xbf16>, vector<8x32xf32> -> vector<8x32xf32>
    %c0_32 = arith.constant 0 : index
    %c0_33 = arith.constant 0 : index
    %117 = vector.load %arg6[%c0_32, %c0_33] : memref<1x32xf32, #tpu.memory_space<vmem>>, vector<1x32xf32>
    %118 = vector.broadcast %117 : vector<1x32xf32> to vector<8x32xf32>
    %119 = arith.addf %116, %118 : vector<8x32xf32>
    %120 = arith.addf %0, %119 : vector<8x32xf32>
    %c0_34 = arith.constant 0 : index
    %c0_35 = arith.constant 0 : index
    %121 = vector.load %arg7[%c0_34, %c0_35] : memref<1x32xf32, #tpu.memory_space<vmem>>, vector<1x32xf32>
    %c0_36 = arith.constant 0 : index
    %c0_37 = arith.constant 0 : index
    %122 = vector.load %arg8[%c0_36, %c0_37] : memref<1x32xf32, #tpu.memory_space<vmem>>, vector<1x32xf32>
    %cst_38 = arith.constant dense<0.000000e+00> : vector<8xf32>
    %123 = vector.multi_reduction <add>, %120, %cst_38 [1] : vector<8x32xf32> to vector<8xf32>
    %124 = vector.shape_cast %123 : vector<8xf32> to vector<8x1xf32>
    %cst_39 = arith.constant 3.200000e+01 : f32
    %125 = vector.broadcast %cst_39 : f32 to vector<8x1xf32>
    %126 = arith.divf %124, %125 : vector<8x1xf32>
    %127 = arith.mulf %120, %120 : vector<8x32xf32>
    %cst_40 = arith.constant dense<0.000000e+00> : vector<8xf32>
    %128 = vector.multi_reduction <add>, %127, %cst_40 [1] : vector<8x32xf32> to vector<8xf32>
    %129 = vector.shape_cast %128 : vector<8xf32> to vector<8x1xf32>
    %cst_41 = arith.constant 3.200000e+01 : f32
    %130 = vector.broadcast %cst_41 : f32 to vector<8x1xf32>
    %131 = arith.divf %129, %130 : vector<8x1xf32>
    %132 = arith.mulf %126, %126 : vector<8x1xf32>
    %133 = arith.subf %131, %132 : vector<8x1xf32>
    %134 = vector.broadcast %126 : vector<8x1xf32> to vector<8x32xf32>
    %135 = arith.subf %120, %134 : vector<8x32xf32>
    %cst_42 = arith.constant 9.99999974E-6 : f32
    %136 = vector.broadcast %cst_42 : f32 to vector<8x1xf32>
    %137 = arith.addf %133, %136 : vector<8x1xf32>
    %138 = math.rsqrt %137 : vector<8x1xf32>
    %139 = vector.broadcast %138 : vector<8x1xf32> to vector<8x32xf32>
    %140 = arith.mulf %135, %139 : vector<8x32xf32>
    %141 = vector.broadcast %121 : vector<1x32xf32> to vector<8x32xf32>
    %142 = arith.mulf %140, %141 : vector<8x32xf32>
    %143 = vector.broadcast %122 : vector<1x32xf32> to vector<8x32xf32>
    %144 = arith.addf %142, %143 : vector<8x32xf32>
    %145 = arith.truncf %144 : vector<8x32xf32> to vector<8x32xbf16>
    %c0_43 = arith.constant 0 : index
    %c0_44 = arith.constant 0 : index
    %146 = vector.load %arg9[%c0_43, %c0_44] : memref<32x64xbf16, #tpu.memory_space<vmem>>, vector<32x64xbf16>
    %cst_45 = arith.constant dense<0.000000e+00> : vector<8x64xf32>
    %147 = tpu.matmul %145, %146, %cst_45 {dimension_numbers = #tpu.dot_dimension_numbers<[1], [0], [0], [1], [0, 0, 1, 1], [], []>} : vector<8x32xbf16>, vector<32x64xbf16>, vector<8x64xf32> -> vector<8x64xf32>
    %c0_46 = arith.constant 0 : index
    %c0_47 = arith.constant 0 : index
    %148 = vector.load %arg10[%c0_46, %c0_47] : memref<1x64xf32, #tpu.memory_space<vmem>>, vector<1x64xf32>
    %149 = vector.broadcast %148 : vector<1x64xf32> to vector<8x64xf32>
    %150 = arith.addf %147, %149 : vector<8x64xf32>
    %151 = arith.truncf %150 : vector<8x64xf32> to vector<8x64xbf16>
    %152 = arith.mulf %151, %151 : vector<8x64xbf16>
    %153 = arith.mulf %151, %152 : vector<8x64xbf16>
    %cst_48 = arith.constant 4.467770e-02 : bf16
    %154 = vector.broadcast %cst_48 : bf16 to vector<8x64xbf16>
    %155 = arith.mulf %154, %153 : vector<8x64xbf16>
    %156 = arith.addf %151, %155 : vector<8x64xbf16>
    %cst_49 = arith.constant 7.968750e-01 : bf16
    %157 = vector.broadcast %cst_49 : bf16 to vector<8x64xbf16>
    %158 = arith.mulf %157, %156 : vector<8x64xbf16>
    %159 = math.tanh %158 : vector<8x64xbf16>
    %cst_50 = arith.constant 1.000000e+00 : bf16
    %160 = vector.broadcast %cst_50 : bf16 to vector<8x64xbf16>
    %161 = arith.addf %160, %159 : vector<8x64xbf16>
    %cst_51 = arith.constant 5.000000e-01 : bf16
    %162 = vector.broadcast %cst_51 : bf16 to vector<8x64xbf16>
    %163 = arith.mulf %162, %161 : vector<8x64xbf16>
    %164 = arith.mulf %151, %163 : vector<8x64xbf16>
    %c0_52 = arith.constant 0 : index
    %c0_53 = arith.constant 0 : index
    %165 = vector.load %arg11[%c0_52, %c0_53] : memref<64x32xbf16, #tpu.memory_space<vmem>>, vector<64x32xbf16>
    %cst_54 = arith.constant dense<0.000000e+00> : vector<8x32xf32>
    %166 = tpu.matmul %164, %165, %cst_54 {dimension_numbers = #tpu.dot_dimension_numbers<[1], [0], [0], [1], [0, 0, 1, 1], [], []>} : vector<8x64xbf16>, vector<64x32xbf16>, vector<8x32xf32> -> vector<8x32xf32>
    %c0_55 = arith.constant 0 : index
    %c0_56 = arith.constant 0 : index
    %167 = vector.load %arg12[%c0_55, %c0_56] : memref<1x32xf32, #tpu.memory_space<vmem>>, vector<1x32xf32>
    %168 = vector.broadcast %167 : vector<1x32xf32> to vector<8x32xf32>
    %169 = arith.addf %166, %168 : vector<8x32xf32>
    %170 = arith.addf %120, %169 : vector<8x32xf32>
    %c0_57 = arith.constant 0 : index
    %c0_58 = arith.constant 0 : index
    %171 = vector.load %arg13[%c0_57, %c0_58] : memref<8x32xf32, #tpu.memory_space<vmem>>, vector<8x32xf32>
    tpu.vector_store %arg13[%c0_57, %c0_58], %170 {strides = array<i32>} : memref<8x32xf32, #tpu.memory_space<vmem>>, vector<8x32xf32>,
    return
  }
  func.func @transform_0(%arg0: i32) -> (i32, i32) {
    %c0_i32 = arith.constant 0 : i32
    %c0_i32_0 = arith.constant 0 : i32
    return %arg0, %c0_i32 : i32, i32
  }
  func.func @transform_1(%arg0: i32) -> (i32, i32) {
    %c0_i32 = arith.constant 0 : i32
    %c0_i32_0 = arith.constant 0 : i32
    %c0_i32_1 = arith.constant 0 : i32
    return %c0_i32, %c0_i32_0 : i32, i32
  }
  func.func @transform_2(%arg0: i32) -> (i32, i32) {
    %c0_i32 = arith.constant 0 : i32
    %c0_i32_0 = arith.constant 0 : i32
    %c0_i32_1 = arith.constant 0 : i32
    return %c0_i32, %c0_i32_0 : i32, i32
  }
  func.func @transform_3(%arg0: i32) -> (i32, i32) {
    %c0_i32 = arith.constant 0 : i32
    %c0_i32_0 = arith.constant 0 : i32
    %c0_i32_1 = arith.constant 0 : i32
    return %c0_i32, %c0_i32_0 : i32, i32
  }
  func.func @transform_4(%arg0: i32) -> (i32, i32) {
    %c0_i32 = arith.constant 0 : i32
    %c0_i32_0 = arith.constant 0 : i32
    %c0_i32_1 = arith.constant 0 : i32
    return %c0_i32, %c0_i32_0 : i32, i32
  }
  func.func @transform_5(%arg0: i32) -> (i32, i32) {
    %c0_i32 = arith.constant 0 : i32
    %c0_i32_0 = arith.constant 0 : i32
    %c0_i32_1 = arith.constant 0 : i32
    return %c0_i32, %c0_i32_0 : i32, i32
  }
  func.func @transform_6(%arg0: i32) -> (i32, i32) {
    %c0_i32 = arith.constant 0 : i32
    %c0_i32_0 = arith.constant 0 : i32
    %c0_i32_1 = arith.constant 0 : i32
    return %c0_i32, %c0_i32_0 : i32, i32
  }
  func.func @transform_7(%arg0: i32) -> (i32, i32) {
    %c0_i32 = arith.constant 0 : i32
    %c0_i32_0 = arith.constant 0 : i32
    %c0_i32_1 = arith.constant 0 : i32
    return %c0_i32, %c0_i32_0 : i32, i32
  }
  func.func @transform_8(%arg0: i32) -> (i32, i32) {
    %c0_i32 = arith.constant 0 : i32
    %c0_i32_0 = arith.constant 0 : i32
    %c0_i32_1 = arith.constant 0 : i32
    return %c0_i32, %c0_i32_0 : i32, i32
  }
  func.func @transform_9(%arg0: i32) -> (i32, i32) {
    %c0_i32 = arith.constant 0 : i32
    %c0_i32_0 = arith.constant 0 : i32
    %c0_i32_1 = arith.constant 0 : i32
    return %c0_i32, %c0_i32_0 : i32, i32
  }
  func.func @transform_10(%arg0: i32) -> (i32, i32) {
    %c0_i32 = arith.constant 0 : i32
    %c0_i32_0 = arith.constant 0 : i32
    %c0_i32_1 = arith.constant 0 : i32
    return %c0_i32, %c0_i32_0 : i32, i32
  }
  func.func @transform_11(%arg0: i32) -> (i32, i32) {
    %c0_i32 = arith.constant 0 : i32
    %c0_i32_0 = arith.constant 0 : i32
    %c0_i32_1 = arith.constant 0 : i32
    return %c0_i32, %c0_i32_0 : i32, i32
  }
  func.func @transform_12(%arg0: i32) -> (i32, i32) {
    %c0_i32 = arith.constant 0 : i32
    %c0_i32_0 = arith.constant 0 : i32
    return %arg0, %c0_i32 : i32, i32
  }
}

</mosaic_0001>

<bundles_post_ra>
// kernel: tpu_custom_call.1
= control target key start
LH: loop header
LB: loop body
LE: loop exit
PB: predicated region body
PF: predicated region fallthrough
CT: control target
= control target key end

     0   :  { %s3029_s0 = inlined_call_operand.hbm [shape: f32[16,32], index: 0, kind: input, shape index: {}]   ;;  %s3030_s1 = inlined_call_operand.hbm [shape: f32[1,32], index: 1, kind: input, shape index: {}]   ;;  %s3031_s2 = inlined_call_operand.hbm [shape: f32[1,32], index: 2, kind: input, shape index: {}]   ;;  %s3032_s3 = inlined_call_operand.hbm [shape: bf16[32,96], index: 3, kind: input, shape index: {}]   ;;  %s3033_s4 = inlined_call_operand.hbm [shape: bf16[32,32], index: 4, kind: input, shape index: {}]   ;;  %s3034_s5 = inlined_call_operand.hbm [shape: f32[1,32], index: 5, kind: input, shape index: {}]   ;;  %s3035_s6 = inlined_call_operand.hbm [shape: f32[1,32], index: 6, kind: input, shape index: {}]   ;;  %s3036_s7 = inlined_call_operand.hbm [shape: f32[1,32], index: 7, kind: input, shape index: {}]   ;;  %s3037_s8 = inlined_call_operand.hbm [shape: bf16[32,64], index: 8, kind: input, shape index: {}]   ;;  %s3038_s9 = inlined_call_operand.hbm [shape: f32[1,64], index: 9, kind: input, shape index: {}]   ;;  %s3039_s10 = inlined_call_operand.hbm [shape: bf16[64,32], index: 10, kind: input, shape index: {}]   ;;  %s3040_s11 = inlined_call_operand.hbm [shape: f32[1,32], index: 11, kind: input, shape index: {}]   ;;  %s3041_s12 = inlined_call_operand.hbm [shape: f32[16,32], index: 12, kind: output, shape index: {}]  }
   0x1   :  { %3051 = sst [smem:[#allocation32_spill]] %s3030_s1 }
   0x2   :  { %3052 = sst [smem:[#allocation33_spill]] %s3031_s2 }
   0x3   :  { %3053 = sst [smem:[#allocation34_spill]] %s3032_s3 }
   0x4   :  { %3054 = sst [smem:[#allocation35_spill]] %s3041_s12 }
   0x5   :  { %17 = vsyncpa [#allocation3], 0 }
   0x6   :  { %19 = vsyncpa [#allocation3 + $0x1], 0 }
   0x7   :  { %20 = vsyncpa [#allocation6], 0 }
   0x8   :  { %21 = vsyncpa [#allocation9], 0 }
   0x9   :  { %22 = vsyncpa [#allocation12], 0 }
   0xa   :  { %23 = vsyncpa [#allocation15], 0 }
   0xb   :  { %24 = vsyncpa [#allocation18], 0 }
   0xc   :  { %25 = vsyncpa [#allocation21], 0 }
   0xd   :  { %26 = vsyncpa [#allocation4], 0 }
   0xe   :  { %28 = vsyncpa [#allocation4 + $0x1], 0  ;;  %s2496_s21 = smov 0   ;;  %s2498_s22 = smov 0  }
   0xf   :  { %s2500_s23 = smov 0   ;;  %s2502_s24 = smov 0  }
  0x10 LB: > { %s2400_s25 = smov [#allocation5]   ;;  %s2517_s27 = sadd.s32 4294967295, %s2398_s24   ;;  %s2398_s24 = sphi %s2502_s24, %s3090_s24   ;;  %s2394_s23 = sphi %s2500_s23, %s3089_s23   ;;  %s2390_s22 = sphi %s2498_s22, %s3088_s22   ;;  %s2386_s21 = sphi %s2496_s21, %s3087_s21  }
  0x11   : > { %s335_s26 = sshll.u32 %s2400_s25, 4  ;;  %p1587_p0 = scmp.ge.s32.totalorder %s2398_s24, 1  ;;  %s2522_s26 = int_to_ptr.vmem [resolvable:$true] %s335_s26 }
  0x12   : > { %p3048_p1 = scmp.eq.s32.totalorder %s2517_s27, 0  ;;  %p322_p2 = scmp.lt.s32.totalorder %s2398_s24, 3 }
  0x13   : > { %s2401_s29 = smov [#allocation8]   ;;  %s2402_s14 = smov [#allocation11]  }
  0x14   : > { %p2524_p3 = pnand %p1587_p0, %p322_p2  ;;  %s356_s30 = sshll.u32 %s2401_s29, 4  ;;  %s2531_s30 = int_to_ptr.vmem [resolvable:$true] %s356_s30 }
  0x15   : > { %s383_s15 = sshll.u32 %s2402_s14, 4  ;;  %s3058_s1 = sld [smem:[#allocation32_spill]]  ;;  %s2539_s15 = int_to_ptr.vmem [resolvable:$true] %s383_s15 }
  0x16   : > { %s3055_s28 = scalar_select %p2524_p3, 1, 0 }
  0x17   : > { %p1811_p5 = pneg %p2524_p3 }
  0x18   : > { %3056 = sst [smem:[#allocation31_spill]] %s3055_s28 }
  0x19   : > { %p2535_p6 = pnand %p1811_p5, %p3048_p1 }
  0x1b   : > { %s1970_s18 = scalar_lea.hbm %s3058_s1, 16  ;;  %p2549_p8 = pneg %p2535_p6 }
  0x1c   : > { %p1971_p7 = scmp.ne.s32.totalorder %s3058_s1, %s1970_s18  ;;  %p1977_p11 = scmp.lt.u32.totalorder %s1970_s18, %s3058_s1 }
  0x1e   : > { %p1973_p9 = pnand %p2549_p8, %p1971_p7 }
  0x20   : > { %p1974_p10 = pneg %p1973_p9 }
  0x22   : > { %p1979_p12 = pnand %p1977_p11, %p1974_p10 }
  0x24   : > { %1982 = shalt.err (!%p1979_p12)
}
  0x25   : > { %s1983_s16 = scalar_lea.vmem %s2522_s26, 16  ;;  %s1990_s17 = scalar_lea.vmem %s2522_s26, 32 }
  0x26   : > { %p1984_p13 = scmp.ne.s32.totalorder %s2522_s26, %s1983_s16  ;;  %p1991_p5 = scmp.lt.s32.totalorder %s2522_s26, %s2522_s26 }
  0x27   : > { %p1992_p7 = scmp.lt.s32.totalorder %s1990_s17, %s1983_s16 }
  0x28   : > { %p1986_p0 = pnand %p1984_p13, %p2549_p8 }
  0x29   : > { %p1993_p9 = por %p1992_p7, %p1991_p5 }
  0x2a   : > { %p1987_p2 = pneg %p1986_p0 }
  0x2c   : > { %p1994_p4 = pnand %p1993_p9, %p1987_p2 }
  0x2e   : > { %1997 = shalt.err (!%p1994_p4)
}
  0x2f   : > { %1814 = dma.hbm_to_vmem [thread:$0]  (!%p2535_p6), %s3058_s1, 16, %s2522_s26, [#allocation6]  }
  0x30   : > { %s3060_s3 = sld [smem:[#allocation34_spill]] }
  0x36   : > { %s1998_s14 = scalar_lea.hbm %s3060_s3, 256 }
  0x37   : > { %p1999_p10 = scmp.ne.s32.totalorder %s3060_s3, %s1998_s14  ;;  %p2005_p4 = scmp.lt.u32.totalorder %s1998_s14, %s3060_s3 }
  0x39   : > { %p2001_p11 = pnand %p1999_p10, %p2549_p8 }
  0x3b   : > { %p2002_p12 = pneg %p2001_p11 }
  0x3d   : > { %p2007_p13 = pnand %p2005_p4, %p2002_p12 }
  0x3f   : > { %2010 = shalt.err (!%p2007_p13)
}
  0x40   : > { %s2011_s26 = scalar_lea.vmem %s2531_s30, 256  ;;  %p2019_p7 = scmp.lt.s32.totalorder %s2531_s30, %s2531_s30 }
  0x41   : > { %p2012_p0 = scmp.ne.s32.totalorder %s2531_s30, %s2011_s26  ;;  %p2020_p9 = scmp.lt.s32.totalorder %s2011_s26, %s2011_s26 }
  0x43   : > { %p2014_p2 = pnand %p2012_p0, %p2549_p8  ;;  %p2021_p10 = por %p2020_p9, %p2019_p7 }
  0x45   : > { %p2015_p5 = pneg %p2014_p2 }
  0x47   : > { %p2022_p11 = pnand %p2021_p10, %p2015_p5 }
  0x49   : > { %2025 = shalt.err (!%p2022_p11)
}
  0x4a   : > { %s3044_s12 = smov 64   ;;  %s3046_s28 = smov 4  }
  0x4b   : > { %1820 = dma.hbm_to_vmem [thread:$0]  (!%p2535_p6), %s3060_s3, 256, %s2531_s30, [#allocation9], %s3044_s12, %s3044_s12, %s3046_s28  }
  0x4c   : > { %s2026_s14 = scalar_lea.hbm %s3034_s5, 16 }
  0x4d   : > { %p2027_p12 = scmp.ne.s32.totalorder %s3034_s5, %s2026_s14  ;;  %p2033_p0 = scmp.lt.u32.totalorder %s2026_s14, %s3034_s5 }
  0x4f   : > { %p2029_p4 = pnand %p2027_p12, %p2549_p8 }
  0x51   : > { %p2030_p13 = pneg %p2029_p4 }
  0x53   : > { %p2035_p2 = pnand %p2033_p0, %p2030_p13 }
  0x55   : > { %2038 = shalt.err (!%p2035_p2)
}
  0x56   : > { %s2039_s30 = scalar_lea.vmem %s2539_s15, 16  ;;  %s2046_s18 = scalar_lea.vmem %s2539_s15, 32 }
  0x57   : > { %p2040_p5 = scmp.ne.s32.totalorder %s2539_s15, %s2039_s30  ;;  %p2047_p10 = scmp.lt.s32.totalorder %s2539_s15, %s2539_s15 }
  0x58   : > { %p2048_p11 = scmp.lt.s32.totalorder %s2046_s18, %s2039_s30 }
  0x59   : > { %p2042_p7 = pnand %p2040_p5, %p2549_p8 }
  0x5a   : > { %p2049_p12 = por %p2048_p11, %p2047_p10 }
  0x5b   : > { %p2043_p9 = pneg %p2042_p7 }
  0x5d   : > { %p2050_p4 = pnand %p2049_p12, %p2043_p9 }
  0x5f   : > { %2053 = shalt.err (!%p2050_p4)
}
  0x60   : > { %1826 = dma.hbm_to_vmem [thread:$0]  (!%p2535_p6), %s3034_s5, 16, %s2539_s15, [#allocation12]  }
  0x61   : > { %s2405_s20 = smov [#allocation14]   ;;  %s2406_s14 = smov [#allocation17]  }
  0x62   : > { %s405_s29 = sshll.u32 %s2405_s20, 4  ;;  %s429_s16 = sshll.u32 %s2406_s14, 4  ;;  %s406_s29 = int_to_ptr.vmem [resolvable:$true] %s405_s29  ;;  %s430_s16 = int_to_ptr.vmem [resolvable:$true] %s429_s16 }
  0x63   : > { %s2054_s30 = scalar_lea.hbm %s3036_s7, 16 }
  0x64   : > { %p2055_p13 = scmp.ne.s32.totalorder %s3036_s7, %s2054_s30  ;;  %p2061_p5 = scmp.lt.u32.totalorder %s2054_s30, %s3036_s7 }
  0x66   : > { %p2057_p0 = pnand %p2055_p13, %p2549_p8 }
  0x68   : > { %p2058_p2 = pneg %p2057_p0 }
  0x6a   : > { %p2063_p7 = pnand %p2061_p5, %p2058_p2 }
  0x6c   : > { %2066 = shalt.err (!%p2063_p7)
}
  0x6d   : > { %s2067_s15 = scalar_lea.vmem %s406_s29, 16  ;;  %s2074_s19 = scalar_lea.vmem %s406_s29, 32 }
  0x6e   : > { %p2068_p9 = scmp.ne.s32.totalorder %s406_s29, %s2067_s15  ;;  %p2075_p12 = scmp.lt.s32.totalorder %s406_s29, %s406_s29 }
  0x6f   : > { %p2076_p4 = scmp.lt.s32.totalorder %s2074_s19, %s2067_s15 }
  0x70   : > { %p2070_p10 = pnand %p2068_p9, %p2549_p8 }
  0x71   : > { %p2077_p1 = por %p2076_p4, %p2075_p12 }
  0x72   : > { %p2071_p11 = pneg %p2070_p10 }
  0x74   : > { %p2078_p3 = pnand %p2077_p1, %p2071_p11 }
  0x76   : > { %2081 = shalt.err (!%p2078_p3)
}
  0x77   : > { %1832 = dma.hbm_to_vmem [thread:$0]  (!%p2535_p6), %s3036_s7, 16, %s406_s29, [#allocation15]  }
  0x78   : > { %s2082_s17 = scalar_lea.hbm %s3038_s9, 16 }
  0x79   : > { %p2083_p13 = scmp.ne.s32.totalorder %s3038_s9, %s2082_s17  ;;  %p2089_p3 = scmp.lt.u32.totalorder %s2082_s17, %s3038_s9 }
  0x7b   : > { %p2085_p0 = pnand %p2083_p13, %p2549_p8 }
  0x7d   : > { %p2086_p1 = pneg %p2085_p0 }
  0x7f   : > { %p2091_p2 = pnand %p2089_p3, %p2086_p1 }
  0x81   : > { %2094 = shalt.err (!%p2091_p2)
}
  0x82   : > { %s2095_s15 = scalar_lea.vmem %s430_s16, 16  ;;  %s2102_s29 = scalar_lea.vmem %s430_s16, 32 }
  0x83   : > { %p2096_p5 = scmp.ne.s32.totalorder %s430_s16, %s2095_s15  ;;  %p2103_p10 = scmp.lt.s32.totalorder %s430_s16, %s430_s16 }
  0x84   : > { %p2104_p11 = scmp.lt.s32.totalorder %s2102_s29, %s2095_s15 }
  0x85   : > { %p2098_p7 = pnand %p2096_p5, %p2549_p8 }
  0x86   : > { %p2105_p12 = por %p2104_p11, %p2103_p10 }
  0x87   : > { %p2099_p9 = pneg %p2098_p7 }
  0x89   : > { %p2106_p4 = pnand %p2105_p12, %p2099_p9 }
  0x8b   : > { %2109 = shalt.err (!%p2106_p4)
}
  0x8c   : > { %1838 = dma.hbm_to_vmem [thread:$0]  (!%p2535_p6), %s3038_s9, 16, %s430_s16, [#allocation18]  }
  0x8d   : > { %s2407_s20 = smov [#allocation7]   ;;  %s2408_s14 = smov [#allocation10]  }
  0x8e   : > { %s346_s28 = sshll.u32 %s2407_s20, 4  ;;  %s369_s17 = sshll.u32 %s2408_s14, 4  ;;  %s347_s28 = int_to_ptr.vmem [resolvable:$true] %s346_s28  ;;  %s370_s17 = int_to_ptr.vmem [resolvable:$true] %s369_s17 }
  0x8f   : > { %s3061_s2 = sld [smem:[#allocation33_spill]] }
  0x95   : > { %s2110_s18 = scalar_lea.hbm %s3061_s2, 16 }
  0x96   : > { %p2111_p13 = scmp.ne.s32.totalorder %s3061_s2, %s2110_s18  ;;  %p2117_p3 = scmp.lt.u32.totalorder %s2110_s18, %s3061_s2 }
  0x98   : > { %p2113_p0 = pnand %p2111_p13, %p2549_p8 }
  0x9a   : > { %p2114_p1 = pneg %p2113_p0 }
  0x9c   : > { %p2119_p2 = pnand %p2117_p3, %p2114_p1 }
  0x9e   : > { %2122 = shalt.err (!%p2119_p2)
}
  0x9f   : > { %s2123_s16 = scalar_lea.vmem %s347_s28, 16  ;;  %s2130_s12 = scalar_lea.vmem %s347_s28, 32 }
  0xa0   : > { %p2124_p5 = scmp.ne.s32.totalorder %s347_s28, %s2123_s16  ;;  %p2131_p10 = scmp.lt.s32.totalorder %s347_s28, %s347_s28 }
  0xa1   : > { %p2132_p11 = scmp.lt.s32.totalorder %s2130_s12, %s2123_s16 }
  0xa2   : > { %p2126_p7 = pnand %p2124_p5, %p2549_p8 }
  0xa3   : > { %p2133_p12 = por %p2132_p11, %p2131_p10 }
  0xa4   : > { %p2127_p9 = pneg %p2126_p7 }
  0xa6   : > { %p2134_p4 = pnand %p2133_p12, %p2127_p9 }
  0xa8   : > { %2137 = shalt.err (!%p2134_p4)
}
  0xa9   : > { %1817 = dma.hbm_to_vmem [thread:$0]  (!%p2535_p6), %s3061_s2, 16, %s347_s28, [#allocation6]  }
  0xaa   : > { %s2138_s18 = scalar_lea.hbm %s3033_s4, 256 }
  0xab   : > { %p2139_p13 = scmp.ne.s32.totalorder %s3033_s4, %s2138_s18  ;;  %p2145_p3 = scmp.lt.u32.totalorder %s2138_s18, %s3033_s4 }
  0xad   : > { %p2141_p0 = pnand %p2139_p13, %p2549_p8 }
  0xaf   : > { %p2142_p1 = pneg %p2141_p0 }
  0xb1   : > { %p2147_p2 = pnand %p2145_p3, %p2142_p1 }
  0xb3   : > { %2150 = shalt.err (!%p2147_p2)
}
  0xb4   : > { %s2151_s16 = scalar_lea.vmem %s370_s17, 256  ;;  %p2159_p10 = scmp.lt.s32.totalorder %s370_s17, %s370_s17 }
  0xb5   : > { %p2152_p5 = scmp.ne.s32.totalorder %s370_s17, %s2151_s16  ;;  %p2160_p11 = scmp.lt.s32.totalorder %s2151_s16, %s2151_s16 }
  0xb7   : > { %p2154_p7 = pnand %p2152_p5, %p2549_p8  ;;  %p2161_p12 = por %p2160_p11, %p2159_p10 }
  0xb9   : > { %p2155_p9 = pneg %p2154_p7 }
  0xbb   : > { %p2162_p4 = pnand %p2161_p12, %p2155_p9 }
  0xbd   : > { %2165 = shalt.err (!%p2162_p4)
}
  0xbe   : > { %s3062_s28 = smov 4   ;;  %s3063_s12 = smov 64  }
  0xbf   : > { %1823 = dma.hbm_to_vmem [thread:$0]  (!%p2535_p6), %s3033_s4, 256, %s370_s17, [#allocation9], %s3063_s12, %s3063_s12, %s3062_s28  }
  0xc0   : > { %s2409_s26 = smov [#allocation13]   ;;  %s2410_s18 = smov [#allocation16]  }
  0xc1   : > { %s394_s30 = sshll.u32 %s2409_s26, 4  ;;  %s415_s1 = sshll.u32 %s2410_s18, 4  ;;  %s395_s30 = int_to_ptr.vmem [resolvable:$true] %s394_s30  ;;  %s416_s1 = int_to_ptr.vmem [resolvable:$true] %s415_s1 }
  0xc2   : > { %s2166_s19 = scalar_lea.hbm %s3035_s6, 16 }
  0xc3   : > { %p2167_p13 = scmp.ne.s32.totalorder %s3035_s6, %s2166_s19  ;;  %p2173_p3 = scmp.lt.u32.totalorder %s2166_s19, %s3035_s6 }
  0xc5   : > { %p2169_p0 = pnand %p2167_p13, %p2549_p8 }
  0xc7   : > { %p2170_p1 = pneg %p2169_p0 }
  0xc9   : > { %p2175_p2 = pnand %p2173_p3, %p2170_p1 }
  0xcb   : > { %2178 = shalt.err (!%p2175_p2)
}
  0xcc   : > { %s2179_s17 = scalar_lea.vmem %s395_s30, 16  ;;  %s2186_s14 = scalar_lea.vmem %s395_s30, 32 }
  0xcd   : > { %p2180_p5 = scmp.ne.s32.totalorder %s395_s30, %s2179_s17  ;;  %p2187_p10 = scmp.lt.s32.totalorder %s395_s30, %s395_s30 }
  0xce   : > { %p2188_p11 = scmp.lt.s32.totalorder %s2186_s14, %s2179_s17 }
  0xcf   : > { %p2182_p7 = pnand %p2180_p5, %p2549_p8 }
  0xd0   : > { %p2189_p12 = por %p2188_p11, %p2187_p10 }
  0xd1   : > { %p2183_p9 = pneg %p2182_p7 }
  0xd3   : > { %p2190_p4 = pnand %p2189_p12, %p2183_p9 }
  0xd5   : > { %2193 = shalt.err (!%p2190_p4)
}
  0xd6   : > { %1829 = dma.hbm_to_vmem [thread:$0]  (!%p2535_p6), %s3035_s6, 16, %s395_s30, [#allocation12]  }
  0xd7   : > { %s2194_s15 = scalar_lea.hbm %s3037_s8, 256 }
  0xd8   : > { %p2195_p13 = scmp.ne.s32.totalorder %s3037_s8, %s2194_s15  ;;  %p2201_p3 = scmp.lt.u32.totalorder %s2194_s15, %s3037_s8 }
  0xda   : > { %p2197_p0 = pnand %p2195_p13, %p2549_p8 }
  0xdc   : > { %p2198_p1 = pneg %p2197_p0 }
  0xde   : > { %p2203_p2 = pnand %p2201_p3, %p2198_p1 }
  0xe0   : > { %2206 = shalt.err (!%p2203_p2)
}
  0xe1   : > { %s2207_s17 = scalar_lea.vmem %s416_s1, 256  ;;  %p2215_p10 = scmp.lt.s32.totalorder %s416_s1, %s416_s1 }
  0xe2   : > { %p2208_p5 = scmp.ne.s32.totalorder %s416_s1, %s2207_s17  ;;  %p2216_p11 = scmp.lt.s32.totalorder %s2207_s17, %s2207_s17 }
  0xe4   : > { %p2210_p7 = pnand %p2208_p5, %p2549_p8  ;;  %p2217_p12 = por %p2216_p11, %p2215_p10 }
  0xe6   : > { %p2211_p9 = pneg %p2210_p7 }
  0xe8   : > { %p2218_p4 = pnand %p2217_p12, %p2211_p9 }
  0xea   : > { %2221 = shalt.err (!%p2218_p4)
}
  0xeb   : > { %1835 = dma.hbm_to_vmem [thread:$0]  (!%p2535_p6), %s3037_s8, 256, %s416_s1, [#allocation15], %s3063_s12, %s3063_s12, %s3062_s28  }
  0xec   : > { %s2411_s2 = smov [#allocation19]   ;;  %s2412_s3 = smov [#allocation20]  }
  0xed   : > { %s439_s26 = sshll.u32 %s2411_s2, 4  ;;  %s453_s18 = sshll.u32 %s2412_s3, 4  ;;  %s440_s26 = int_to_ptr.vmem [resolvable:$true] %s439_s26  ;;  %s454_s18 = int_to_ptr.vmem [resolvable:$true] %s453_s18 }
  0xee   : > { %s2222_s19 = scalar_lea.hbm %s3039_s10, 512 }
  0xef   : > { %p2223_p13 = scmp.ne.s32.totalorder %s3039_s10, %s2222_s19  ;;  %p2229_p3 = scmp.lt.u32.totalorder %s2222_s19, %s3039_s10 }
  0xf1   : > { %p2225_p0 = pnand %p2223_p13, %p2549_p8 }
  0xf3   : > { %p2226_p1 = pneg %p2225_p0 }
  0xf5   : > { %p2231_p2 = pnand %p2229_p3, %p2226_p1 }
  0xf7   : > { %2234 = shalt.err (!%p2231_p2)
}
  0xf8   : > { %s2235_s1 = scalar_lea.vmem %s440_s26, 512  ;;  %p2243_p10 = scmp.lt.s32.totalorder %s440_s26, %s440_s26 }
  0xf9   : > { %p2236_p5 = scmp.ne.s32.totalorder %s440_s26, %s2235_s1  ;;  %p2244_p11 = scmp.lt.s32.totalorder %s2235_s1, %s2235_s1 }
  0xfb   : > { %p2238_p7 = pnand %p2236_p5, %p2549_p8  ;;  %p2245_p12 = por %p2244_p11, %p2243_p10 }
  0xfd   : > { %p2239_p9 = pneg %p2238_p7 }
  0xff   : > { %p2246_p4 = pnand %p2245_p12, %p2239_p9 }
 0x101   : > { %2249 = shalt.err (!%p2246_p4)
}
 0x102   : > { %1841 = dma.hbm_to_vmem [thread:$0]  (!%p2535_p6), %s3039_s10, 512, %s440_s26, [#allocation18], %s3063_s12, %s3063_s12, %s3062_s28  }
 0x103   : > { %s2250_s29 = scalar_lea.hbm %s3040_s11, 16 }
 0x104   : > { %p2251_p13 = scmp.ne.s32.totalorder %s3040_s11, %s2250_s29  ;;  %p2257_p3 = scmp.lt.u32.totalorder %s2250_s29, %s3040_s11 }
 0x106   : > { %p2253_p0 = pnand %p2251_p13, %p2549_p8 }
 0x108   : > { %p2254_p1 = pneg %p2253_p0 }
 0x10a   : > { %p2259_p2 = pnand %p2257_p3, %p2254_p1 }
 0x10c   : > { %2262 = shalt.err (!%p2259_p2)
}
 0x10d   : > { %s2263_s30 = scalar_lea.vmem %s454_s18, 16  ;;  %s2270_s28 = scalar_lea.vmem %s454_s18, 32 }
 0x10e   : > { %p2264_p5 = scmp.ne.s32.totalorder %s454_s18, %s2263_s30  ;;  %p2271_p10 = scmp.lt.s32.totalorder %s454_s18, %s454_s18 }
 0x10f   : > { %p2272_p11 = scmp.lt.s32.totalorder %s2270_s28, %s2263_s30 }
 0x110   : > { %p2266_p7 = pnand %p2264_p5, %p2549_p8 }
 0x111   : > { %p2273_p12 = por %p2272_p11, %p2271_p10 }
 0x112   : > { %p2267_p9 = pneg %p2266_p7 }
 0x114   : > { %p2274_p4 = pnand %p2273_p12, %p2267_p9 }
 0x116   : > { %2277 = shalt.err (!%p2274_p4)
}
 0x117   : > { %1844 = dma.hbm_to_vmem [thread:$0]  (!%p2535_p6), %s3040_s11, 16, %s454_s18, [#allocation21]  }
 0x118   : > { %s1586_s25 = sadd.s32 4294967294, %s2398_s24   ;;  %s2776_s13 = sadd.s32 1, %s2398_s24  }
 0x119   : > { %s41_s1 = sadd.s32 1, %s2394_s23  ;;  %s38_s14 = ssub.s32 %s2398_s24, %s2776_s13 }
 0x11a   : > { %p48_p8 = scmp.ne.s32.totalorder %s2394_s23, %s2390_s22  ;;  %p39_p13 = scmp.eq.s32.totalorder %s38_s14, 0 }
 0x11b   : > { %p49_p0 = scmp.eq.s32.totalorder %s2398_s24, 0  ;;  %p54_p1 = scmp.ne.s32.totalorder %s2390_s22, %s2386_s21 }
 0x11c   : > { %p309_p3 = scmp.eq.s32.totalorder %s2517_s27, 1  ;;  %p3064_p5 = scmp.eq.s32.totalorder %s2517_s27, 0 }
 0x11d   : > { %s2788_s2 = scalar_select %p39_p13, %s2394_s23, %s41_s1  }
 0x11e   : > { %p50_p2 = por %p49_p0, %p48_p8  ;;  %p2792_p7 = por %p3064_p5, %p54_p1 }
 0x11f   : > { %p2796_p6 = por %p309_p3, %p48_p8  ;;  %p315_p9 = scmp.eq.s32.totalorder %s1586_s25, 1 }
 0x120   : > { %p1864_p10 = scmp.lt.s32.totalorder %s2398_s24, 2  ;;  %s464_s15 = sand.u32 1, %s2394_s23  }
 0x121   : > { %s3066_s18 = scalar_select %p2796_p6, 1, 0 }
 0x122   : > { %p2802_p11 = por %p315_p9, %p54_p1  ;;  %s1600_s19 = sshll.u32 %s464_s15, 3 }
 0x123   : > { %s1601_s16 = sshll.u32 %s2398_s24, 7  ;;  %s468_s28 = scalar_lea.vmem [#allocation2], %s1600_s19 }
 0x124   : > { %s3067_s29 = scalar_select %p2802_p11, 1, 0 }
 0x125   : > { %s2810_s30 = scalar_lea.hbm %s3029_s0, %s1601_s16  ;;  %s475_s12 = sshll.u32 %s468_s28, 4  ;;  %s2816_s12 = int_to_ptr.vmem [resolvable:$true] %s475_s12 }
 0x126   : > { %p2812_p12 = pnand %p1864_p10, %p50_p2  ;;  %s465_s25 = scalar_lea.sflag [#allocation3], %s464_s15 }
 0x127   : > { %s2278_s1 = scalar_lea.hbm %s2810_s30, 128  ;;  %s2283_s16 = scalar_lea.hbm %s3029_s0, 256 }
 0x128   : > { %p2279_p4 = scmp.ne.s32.totalorder %s2810_s30, %s2278_s1  ;;  %p2280_p8 = pneg %p2812_p12 }
 0x129   : > { %p2284_p1 = scmp.lt.u32.totalorder %s2810_s30, %s3029_s0  ;;  %p2285_p3 = scmp.lt.u32.totalorder %s2283_s16, %s2278_s1 }
 0x12a   : > { %p2281_p13 = pnand %p2280_p8, %p2279_p4  ;;  %p2287_p5 = scmp.lt.u32.totalorder %s2278_s1, %s2810_s30 }
 0x12b   : > { %p2286_p2 = por %p2285_p3, %p2284_p1 }
 0x12c   : > { %p2282_p0 = pneg %p2281_p13 }
 0x12d   : > { %p2288_p9 = por %p2287_p5, %p2286_p2 }
 0x12f   : > { %p2289_p10 = pnand %p2288_p9, %p2282_p0 }
 0x131   : > { %2292 = shalt.err (!%p2289_p10)
}
 0x132   : > { %s2293_s15 = scalar_lea.vmem %s2816_s12, 128  ;;  %s2413_s28 = smov [#allocation2]  }
 0x133   : > { %p2294_p4 = scmp.ne.s32.totalorder %s2816_s12, %s2293_s15  ;;  %s2298_s14 = sshll.u32 %s2413_s28, 4  ;;  %s2299_s14 = int_to_ptr.vmem [resolvable:$false] %s2298_s14 }
 0x134   : > { %s2300_s19 = scalar_lea.vmem %s2299_s14, 256  ;;  %p2301_p6 = scmp.lt.s32.totalorder %s2816_s12, %s2299_s14 }
 0x135   : > { %p2296_p13 = pnand %p2294_p4, %p2280_p8  ;;  %p2302_p1 = scmp.lt.s32.totalorder %s2300_s19, %s2293_s15 }
 0x137   : > { %p2297_p11 = pneg %p2296_p13  ;;  %p2303_p3 = por %p2302_p1, %p2301_p6 }
 0x139   : > { %p2304_p2 = pnand %p2303_p3, %p2297_p11 }
 0x13b   : > { %2307 = shalt.err (!%p2304_p2)
}
 0x13c   : > { %1848 = dma.hbm_to_vmem [thread:$0]  (!%p2812_p12), %s2810_s30, 128, %s2816_s12, %s465_s25  }
 0x13d   : > { %s3069_s1 = sld [smem:[#allocation31_spill]] }
 0x143   : > { %p3070_p0 = scmp.ne.s32.totalorder %s3069_s1, 0 }
 0x144   : > { %s2846_s16 = sand.u32 (!%p3070_p0), 1, %s2390_s22  }
 0x145   : > { %484 = sbr.rel (%p3070_p0) target bundleno = 2640 (0xa50), region = 68  ;;  %s1603_s20 = sshll.u32 (!%p3070_p0), %s2846_s16, 3 }
 0x146   : > { %s487_s17 = scalar_lea.sflag (!%p3070_p0), [#allocation3], %s2846_s16  ;;  %s490_s15 = scalar_lea.vmem (!%p3070_p0), [#allocation2], %s1603_s20 }
 0x14c   : > { %2353 = dma.done.wait (%p2792_p7), %s487_s17, 128  }
 0x14d   : > { %2355 = vsyncadd (%p2792_p7), %s487_s17, 4294967168  ;;  %p3071_p6 = scmp.eq.s32.totalorder %s2517_s27, 0 }
 0x14f   : > { %2357 = dma.done.wait (%p3071_p6), [#allocation6], 32   ;;  %p3072_p11 = pmov %p3071_p6 }
 0x150   : > { %p3073_p12 = pmov %p3071_p6 }
 0x151   : > { %2359 = vsyncadd (%p3072_p11), [#allocation6], 4294967264 }
 0x152   : > { %2361 = dma.done.wait (%p3073_p12), [#allocation9], 512   ;;  %p3074_p8 = pmov %p3071_p6 }
 0x153   : > { %p3075_p5 = pmov %p3071_p6 }
 0x154   : > { %2363 = vsyncadd (%p3074_p8), [#allocation9], 4294966784 }
 0x155   : > { %2365 = dma.done.wait (%p3075_p5), [#allocation12], 32   ;;  %p3076_p9 = pmov %p3075_p5 }
 0x156   : > { %p3077_p7 = pmov %p3075_p5 }
 0x157   : > { %2367 = vsyncadd (%p3076_p9), [#allocation12], 4294967264 }
 0x158   : > { %2369 = dma.done.wait (%p3077_p7), [#allocation15], 272   ;;  %p3078_p10 = pmov %p3075_p5 }
 0x159   : > { %p3079_p4 = pmov %p3075_p5 }
 0x15a   : > { %2371 = vsyncadd (%p3078_p10), [#allocation15], 4294967024 }
 0x15b   : > { %2373 = dma.done.wait (%p3079_p4), [#allocation18], 528   ;;  %p3080_p13 = pmov %p3079_p4 }
 0x15c   : > { %p3081_p1 = pmov %p3079_p4 }
 0x15d   : > { %2375 = vsyncadd (%p3080_p13), [#allocation18], 4294966768 }
 0x15e   : > { %2377 = dma.done.wait (%p3081_p1), [#allocation21], 16   ;;  %p3082_p3 = pmov %p3081_p1 }
 0x15f   : > { %vm583_vm0 = vcmask 261120   ;;  %v2880_v0 = vld [vmem:[%s490_s15] sm:$0xff]  ;;  %v1938_v4 = vld [vmem:[#allocation8] sm:$0xff]   ;;  %v2414_v5 = vmov 0.0   ;;  %vm2415_vm1 = vmmov 0   ;;  %s2416_s3 = smov 96  }
 0x160   : > { %2379 = vsyncadd (%p3082_p3), [#allocation21], 4294967280  ;;  %v584_v1 = vsel %vm583_vm0, %v2880_v0, 0.0  ;;  %v589_v2 = vmul.f32 %v2880_v0, %v2880_v0  ;;  %1679 = vmatprep.subr.bf16.mxu0 %v2414_v5  ;;  %1683 = vmatprep.mubr.msk.bf16.mxu0 %vm2415_vm1, %v2414_v5  ;;  %v1939_v6 = vld [vmem:[#allocation8 + $0x8] sm:$0xff]   ;;  %v1616_v16 = vld [vmem:[#allocation5] ss:$0 sm:$0xff] }
 0x161   : > { %585 = vadd.xlane.f32.xlu0 %v584_v1  ;;  %1680 = vmatpush3.bf16.msra.mxu0 %v1938_v4  ;;  %v1617_v18 = vld [vmem:[#allocation7] ss:$0 sm:$0xff]  ;;  %s2417_s30 = smov 120   ;;  %s2418_s12 = smov 88   ;;  %vm680_vm2 = vcmask 64512   ;;  %vm744_vm3 = vcmask 1043456  }
 0x162   : > { %v590_v3 = vsel %vm583_vm0, %v589_v2, 0.0  ;;  %1687 = vmatprep.subr.bf16.mxu1 %v2414_v5  ;;  %1681 = vmatprep.subr.bf16.mxu0 %v2414_v5  ;;  %s2419_s26 = smov 80   ;;  %s2420_s25 = smov 112   ;;  %vm1132_vm4 = vcmask 130048   ;;  %vm1134_vm5 = vcmask 195584   ;;  %vm1351_vm6 = vcmask 523264  }
 0x163   : > { %1689 = vmatprep.mubr.msk.bf16.mxu1 %vm2415_vm1, %v2414_v5  ;;  %s2421_s28 = smov 72   ;;  %s2422_s14 = smov 104  }
 0x164   : > { %s2423_s19 = smov 64   ;;  %s2424_s1 = smov 56  }
 0x165   : > { %591 = vadd.xlane.f32.xlu0 %v590_v3  ;;  %1682 = vmatpush3.bf16.msra.mxu0 %v1939_v6  ;;  %s2425_s17 = smov 48   ;;  %s2426_s15 = smov 40  }
 0x166   : > { %1693 = vmatprep.subr.bf16.mxu0 %v2414_v5  ;;  %p3084_p0 = scmp.ne.s32.totalorder %s3066_s18, 0 }
 0x1ee   : > { %v586_v7 = vpop.xlane.xlu0 %585 }
 0x1ef   : > { %v588_v8 = vmul.f32 0.03125, %v586_v7 }
 0x1f1   : > { %v594_v10 = vmul.f32 %v588_v8, %v588_v8  ;;  %v596_v14 = vsub.f32 %v2880_v0, %v588_v8 }
 0x1f2   : > { %v592_v9 = vpop.xlane.xlu0 %591 }
 0x1f3   : > { %v593_v11 = vmul.f32 0.03125, %v592_v9 }
 0x1f5   : > { %v595_v12 = vsub.f32 %v593_v11, %v594_v10 }
 0x1f7   : > { %v597_v13 = vadd.f32 1e-05, %v595_v12 }
 0x1f9   : > { %1948 = vrsqrt.f32 %v597_v13 }
 0x203   : > { %v1949_v15 = vpop.eup %1948 }
 0x204   : > { %v599_v17 = vmul.f32 %v1949_v15, %v596_v14 }
 0x206   : > { %v606_v19 = vmul.f32 %v1616_v16, %v599_v17 }
 0x208   : > { %v613_v20 = vadd.f32 %v1617_v18, %v606_v19 }
 0x20a   : > { %v614_v21 = vpack.c.bf16 %v613_v20, %v613_v20 }
 0x20c   : > { %1684 = vmatmul.mubr.msk.bf16.vlgmr.msra.gmra.mrb[0].mxu0 %vm583_vm0, %v614_v21 }
 0x20d   : > { %1695 = vmatprep.mubr.msk.bf16.mxu0 %vm2415_vm1, %v2414_v5 }
 0x2df   : > { %v668_v22 = vpop.f32.mrb[0].mxu0 }
 0x2e0   : > { %v674_v23 = vmul.f32 0.17677669, %v668_v22  ;;  %v2899_v24 = vpack.c.bf16 %v668_v22, %v668_v22  ;;  %v1685_v25 = vpop.f32.mrb[1].mxu0 }
 0x2e1   : > { %v671_v26 = vpop.f32.mrb[2].mxu0 }
 0x2e2   : > { %v675_v27 = vpack.c.bf16 %v674_v23, %v674_v23  ;;  %678 = vrot.lane.b32.xlu1 %v2899_v24, %s2416_s3  ;;  %v1686_v28 = vpop.f32.mrb[3].mxu0  ;;  %s2427_s3 = smov 8  }
 0x2e4   : > { %789 = vrot.lane.b32.xlu0 %v675_v27, %s2417_s30  ;;  %s2428_s30 = smov 16  }
 0x2e6   : > { %791 = vrot.lane.b32.xlu1 %v2899_v24, %s2418_s12  ;;  %s2429_s12 = smov 24  }
 0x2ea   : > { %901 = vrot.lane.b32.xlu1 %v2899_v24, %s2419_s26  ;;  %s1646_s26 = sshll.u32 %s2517_s27, 7  ;;  %s1398_s27 = scalar_lea.sflag [#allocation4], %s2846_s16 }
 0x2ee   : > { %899 = vrot.lane.b32.xlu1 %v675_v27, %s2420_s25  ;;  %s574_s25 = scalar_lea.vmem [#allocation22], %s1603_s20 }
 0x2f2   : > { %1011 = vrot.lane.b32.xlu1 %v2899_v24, %s2421_s28  ;;  %s1411_s28 = sshll.u32 %s574_s25, 4  ;;  %s2986_s28 = int_to_ptr.vmem [resolvable:$true] %s1411_s28 }
 0x2f3   : > { %s2308_s20 = scalar_lea.vmem %s2986_s28, 128 }
 0x2f4   : > { %p2309_p2 = scmp.ne.s32.totalorder %s2986_s28, %s2308_s20 }
 0x2f6   : > { %1009 = vrot.lane.b32.xlu1 %v675_v27, %s2422_s14  ;;  %p2310_p6 = pnand %p2309_p2, %p3084_p0 }
 0x2f8   : > { %p2311_p11 = pneg %p2310_p6 }
 0x354   : > { %v679_v29 = vpop.permute.xlu1 %678 }
 0x355   : > { %v685_v30 = vsel %vm680_vm2, %v679_v29, 0 }
 0x356   : > { %1688 = vmatpush3.bf16.xpose.msra.mxu1 %v685_v30  ;;  %v790_v34 = vpop.permute.xlu0 %789 }
 0x357   : > { %1699 = vmatprep.subr.bf16.mxu1 %v2414_v5 }
 0x358   : > { %v792_v31 = vpop.permute.xlu1 %791 }
 0x359   : > { %v797_v32 = vsel %vm680_vm2, %v792_v31, 0 }
 0x35c   : > { %v902_v33 = vpop.permute.xlu1 %901 }
 0x35d   : > { %1690 = vmatmul.mubr.msk.bf16.vlgmr.msra.gmra.mrb[0].mxu1 %vm680_vm2, %v675_v27  ;;  %v907_v36 = vsel %vm680_vm2, %v902_v33, 0 }
 0x35e   : > { %1700 = vmatpush3.bf16.xpose.msra.mxu1 %v797_v32  ;;  %1701 = vmatprep.mubr.msk.bf16.mxu1 %vm2415_vm1, %v2414_v5 }
 0x35f   : > { %1711 = vmatprep.subr.bf16.mxu1 %v2414_v5 }
 0x360   : > { %v900_v35 = vpop.permute.xlu1 %899 }
 0x364   : > { %v1012_v37 = vpop.permute.xlu1 %1011 }
 0x365   : > { %1702 = vmatmul.mubr.msk.bf16.vlgmr.msra.gmra.mrb[4].mxu1 %vm680_vm2, %v790_v34  ;;  %v1017_v38 = vsel %vm680_vm2, %v1012_v37, 0 }
 0x366   : > { %1712 = vmatpush3.bf16.xpose.msra.mxu1 %v907_v36  ;;  %1713 = vmatprep.mubr.msk.bf16.mxu1 %vm2415_vm1, %v2414_v5 }
 0x367   : > { %1723 = vmatprep.subr.bf16.mxu1 %v2414_v5 }
 0x368   : > { %v1010_v39 = vpop.permute.xlu1 %1009 }
 0x36d   : > { %1714 = vmatmul.mubr.msk.bf16.vlgmr.msra.gmra.mrb[8].mxu1 %vm680_vm2, %v900_v35 }
 0x36e   : > { %1724 = vmatpush3.bf16.xpose.msra.mxu1 %v1017_v38  ;;  %1725 = vmatprep.mubr.msk.bf16.mxu1 %vm2415_vm1, %v2414_v5 }
 0x36f   : > { %1735 = vmatprep.subr.bf16.mxu1 %v2414_v5 }
 0x375   : > { %1726 = vmatmul.mubr.msk.bf16.vlgmr.msra.gmra.mrb[12].mxu1 %vm680_vm2, %v1010_v39 }
 0x376   : > { %1739 = vmatprep.mubr.msk.bf16.mxu1 %vm2415_vm1, %v2414_v5 }
 0x430   : > { %v721_v40 = vpop.f32.mrb[0].mxu1 }
 0x431   : > { %v1691_v41 = vpop.f32.mrb[1].mxu1  ;;  %v727_v42 = vsel %vm680_vm2, %v721_v40, -inf }
 0x432   : > { %728 = vmax.xlane.f32.xlu1 %v727_v42  ;;  %v724_v43 = vpop.f32.mrb[2].mxu1 }
 0x433   : > { %v1692_v44 = vpop.f32.mrb[3].mxu1 }
 0x438   : > { %v833_v45 = vpop.f32.mrb[4].mxu1 }
 0x439   : > { %v1703_v46 = vpop.f32.mrb[5].mxu1  ;;  %v839_v47 = vsel %vm680_vm2, %v833_v45, -inf }
 0x43a   : > { %840 = vmax.xlane.f32.xlu0 %v839_v47  ;;  %v836_v48 = vpop.f32.mrb[6].mxu1 }
 0x43b   : > { %v1704_v49 = vpop.f32.mrb[7].mxu1 }
 0x440   : > { %v943_v50 = vpop.f32.mrb[8].mxu1 }
 0x441   : > { %v1715_v51 = vpop.f32.mrb[9].mxu1  ;;  %v949_v52 = vsel %vm680_vm2, %v943_v50, -inf }
 0x442   : > { %950 = vmax.xlane.f32.xlu1 %v949_v52  ;;  %v946_v53 = vpop.f32.mrb[10].mxu1  ;;  %v1941_v51 = vld [vmem:[#allocation10 + $0x8] sm:$0xff]  }
 0x443   : > { %v1716_v54 = vpop.f32.mrb[11].mxu1 }
 0x448   : > { %v1053_v55 = vpop.f32.mrb[12].mxu1 }
 0x449   : > { %v1727_v56 = vpop.f32.mrb[13].mxu1  ;;  %v1059_v57 = vsel %vm680_vm2, %v1053_v55, -inf }
 0x44a   : > { %1060 = vmax.xlane.f32.xlu0 %v1059_v57  ;;  %v1056_v58 = vpop.f32.mrb[14].mxu1 }
 0x44b   : > { %v1728_v59 = vpop.f32.mrb[15].mxu1 }
 0x4bf   : > { %v729_v60 = vpop.xlane.xlu1 %728 }
 0x4c0   : > { %v730_v61 = vsub.f32 %v721_v40, %v729_v60 }
 0x4c2   : > { %v731_v62 = vmul.f32 1.442695, %v730_v61 }
 0x4c4   : > { %1950 = vpow2.f32 %v731_v62 }
 0x4c7   : > { %v841_v63 = vpop.xlane.xlu0 %840 }
 0x4c8   : > { %v842_v1 = vsub.f32 %v833_v45, %v841_v63 }
 0x4ca   : > { %v843_v2 = vmul.f32 1.442695, %v842_v1 }
 0x4cc   : > { %1952 = vpow2.f32 %v843_v2 }
 0x4ce   : > { %v1951_v3 = vpop.eup %1950 }
 0x4cf   : > { %v733_v4 = vsel %vm680_vm2, %v1951_v3, 0.0  ;;  %v951_v13 = vpop.xlane.xlu1 %950 }
 0x4d0   : > { %734 = vadd.xlane.f32.xlu1 %v733_v4  ;;  %v952_v14 = vsub.f32 %v943_v50, %v951_v13  ;;  %v1940_v50 = vld [vmem:[#allocation10] sm:$0xff]   ;;  %v1629_v4 = vld [vmem:[#allocation11] ss:$0 sm:$0xff] }
 0x4d1   : > { %1736 = vmatpush3.bf16.msra.mxu1 %v1940_v50  ;;  %v1639_v50 = vld [vmem:[#allocation20] ss:$0 sm:$0xff] }
 0x4d2   : > { %v953_v15 = vmul.f32 1.442695, %v952_v14  ;;  %1737 = vmatprep.subr.bf16.mxu1 %v2414_v5 }
 0x4d5   : > { %1738 = vmatpush3.bf16.msra.mxu1 %v1941_v51 }
 0x4d6   : > { %v1953_v6 = vpop.eup %1952  ;;  %1751 = vmatprep.subr.bf16.mxu1 %v2414_v5 }
 0x4d7   : > { %v1061_v7 = vpop.xlane.xlu0 %1060  ;;  %v845_v8 = vsel %vm680_vm2, %v1953_v6, 0.0 }
 0x4d8   : > { %v1062_v9 = vsub.f32 %v1053_v55, %v1061_v7  ;;  %846 = vadd.xlane.f32.xlu0 %v845_v8 }
 0x4da   : > { %v1063_v10 = vmul.f32 1.442695, %v1062_v9 }
 0x4dc   : > { %1954 = vpow2.f32 %v1063_v10 }
 0x4dd   : > { %1956 = vpow2.f32 %v953_v15  ;;  %v1942_v15 = vld [vmem:[#allocation16] sm:$0xff]  }
 0x4e1   : > { %739 = vrot.lane.b32.xlu1 %v2899_v24, %s2423_s19 }
 0x4e6   : > { %v1955_v11 = vpop.eup %1954 }
 0x4e7   : > { %v1065_v12 = vsel %vm680_vm2, %v1955_v11, 0.0  ;;  %v1957_v16 = vpop.eup %1956 }
 0x4e8   : > { %1066 = vadd.xlane.f32.xlu0 %v1065_v12  ;;  %v955_v17 = vsel %vm680_vm2, %v1957_v16, 0.0 }
 0x4fe   : > { %851 = vrot.lane.b32.xlu0 %v2899_v24, %s2424_s1  ;;  %s3083_s1 = sld [smem:[#allocation35_spill]] }
 0x505   : > { %956 = vadd.xlane.f32.xlu1 %v955_v17 }
 0x516   : > { %961 = vrot.lane.b32.xlu1 %v2899_v24, %s2425_s17  ;;  %s2984_s17 = scalar_lea.hbm %s3083_s1, %s1646_s26 }
 0x51a   : > { %1071 = vrot.lane.b32.xlu1 %v2899_v24, %s2426_s15  ;;  %s2430_s15 = smov [#allocation22]  }
 0x55d   : > { %v735_v18 = vpop.xlane.xlu1 %734 }
 0x55e   : > { %1958 = vrcp.f32 %v735_v18 }
 0x561   : > { %v740_v19 = vpop.permute.xlu1 %739 }
 0x562   : > { %v746_v20 = vsel %vm744_vm3, %v740_v19, 0 }
 0x563   : > { %1694 = vmatpush3.bf16.msra.mxu0 %v746_v20 }
 0x564   : > { %1705 = vmatprep.subr.bf16.mxu0 %v2414_v5 }
 0x565   : > { %v847_v22 = vpop.xlane.xlu0 %846 }
 0x566   : > { %1960 = vrcp.f32 %v847_v22 }
 0x568   : > { %v1959_v21 = vpop.eup %1958 }
 0x569   : > { %v737_v23 = vmul.f32 %v1959_v21, %v1951_v3 }
 0x56b   : > { %v738_v25 = vpack.c.bf16 %v737_v23, %v737_v23 }
 0x56d   : > { %1696 = vmatmul.mubr.msk.bf16.vlgmr.msra.gmra.mrb[4].mxu0 %vm680_vm2, %v738_v25 }
 0x56e   : > { %1707 = vmatprep.mubr.msk.bf16.mxu0 %vm2415_vm1, %v2414_v5 }
 0x570   : > { %v1961_v24 = vpop.eup %1960 }
 0x571   : > { %v849_v27 = vmul.f32 %v1961_v24, %v1953_v6  ;;  %v1633_v24 = vld [vmem:[#allocation13] ss:$0 sm:$0xff] }
 0x573   : > { %v850_v30 = vpack.c.bf16 %v849_v27, %v849_v27  ;;  %v1634_v27 = vld [vmem:[#allocation14] ss:$0 sm:$0xff] }
 0x575   : > { %v1067_v26 = vpop.xlane.xlu0 %1066 }
 0x579   : > { %v852_v28 = vpop.permute.xlu0 %851 }
 0x57a   : > { %v857_v29 = vsel %vm744_vm3, %v852_v28, 0 }
 0x57b   : > { %1706 = vmatpush3.bf16.msra.mxu0 %v857_v29 }
 0x57c   : > { %1717 = vmatprep.subr.bf16.mxu0 %v2414_v5 }
 0x57e   : > { %1708 = vmatmul.mubr.msk.bf16.vlgmr.msra.gmra.mrb[8].mxu0 %vm680_vm2, %v850_v30 }
 0x57f   : > { %1719 = vmatprep.mubr.msk.bf16.mxu0 %vm2415_vm1, %v2414_v5 }
 0x592   : > { %v957_v31 = vpop.xlane.xlu1 %956 }
 0x593   : > { %1962 = vrcp.f32 %v957_v31  ;;  %v1944_v31 = vld [vmem:[#allocation19] sm:$0xff]  }
 0x594   : > { %1964 = vrcp.f32 %v1067_v26 }
 0x596   : > { %v962_v32 = vpop.permute.xlu1 %961 }
 0x597   : > { %v967_v33 = vsel %vm744_vm3, %v962_v32, 0  ;;  %v1945_v32 = vld [vmem:[#allocation19 + $0x8] sm:$0xff]  }
 0x598   : > { %1718 = vmatpush3.bf16.msra.mxu0 %v967_v33  ;;  %v1946_v33 = vld [vmem:[#allocation19 + $0x10] sm:$0xff]  }
 0x599   : > { %1729 = vmatprep.subr.bf16.mxu0 %v2414_v5 }
 0x59a   : > { %v1072_v36 = vpop.permute.xlu1 %1071 }
 0x59b   : > { %v1077_v39 = vsel %vm744_vm3, %v1072_v36, 0 }
 0x59d   : > { %v1963_v34 = vpop.eup %1962 }
 0x59e   : > { %v959_v35 = vmul.f32 %v1963_v34, %v1957_v16  ;;  %v1965_v38 = vpop.eup %1964  ;;  %v1943_v16 = vld [vmem:[#allocation16 + $0x8] sm:$0xff]  }
 0x59f   : > { %v1069_v40 = vmul.f32 %v1965_v38, %v1955_v11  ;;  %v1947_v34 = vld [vmem:[#allocation19 + $0x18] sm:$0xff]  }
 0x5a0   : > { %v960_v37 = vpack.c.bf16 %v959_v35, %v959_v35  ;;  %v1635_v35 = vld [vmem:[#allocation17] ss:$0 sm:$0xff] }
 0x5a1   : > { %v1070_v41 = vpack.c.bf16 %v1069_v40, %v1069_v40 }
 0x5a2   : > { %1720 = vmatmul.mubr.msk.bf16.vlgmr.msra.gmra.mrb[12].mxu0 %vm680_vm2, %v960_v37 }
 0x5a3   : > { %1730 = vmatpush3.bf16.msra.mxu0 %v1077_v39  ;;  %1731 = vmatprep.mubr.msk.bf16.mxu0 %vm2415_vm1, %v2414_v5 }
 0x5a4   : > { %1743 = vmatprep.subr.bf16.mxu0 %v2414_v5 }
 0x5aa   : > { %1732 = vmatmul.mubr.msk.bf16.vlgmr.msra.gmra.mrb[16].mxu0 %vm680_vm2, %v1070_v41 }
 0x5ab   : > { %1747 = vmatprep.mubr.msk.bf16.mxu0 %vm2415_vm1, %v2414_v5  ;;  %1744 = vmatpush3.bf16.msra.mxu0 %v1942_v15 }
 0x5ac   : > { %1745 = vmatprep.subr.bf16.mxu0 %v2414_v5 }
 0x5af   : > { %1746 = vmatpush3.bf16.msra.mxu0 %v1943_v16 }
 0x640   : > { %v782_v42 = vpop.f32.mrb[4].mxu0 }
 0x641   : > { %v1697_v43 = vpop.f32.mrb[5].mxu0 }
 0x642   : > { %v785_v44 = vpop.f32.mrb[6].mxu0 }
 0x643   : > { %v1698_v45 = vpop.f32.mrb[7].mxu0 }
 0x651   : > { %v893_v46 = vpop.f32.mrb[8].mxu0 }
 0x652   : > { %1120 = vrot.lane.b32.xlu0 %v893_v46, %s2427_s3  ;;  %v1709_v47 = vpop.f32.mrb[9].mxu0  ;;  %s2312_s3 = sshll.u32 %s2430_s15, 4  ;;  %s2313_s3 = int_to_ptr.vmem [resolvable:$false] %s2312_s3 }
 0x653   : > { %v896_v48 = vpop.f32.mrb[10].mxu0  ;;  %p2315_p12 = scmp.lt.s32.totalorder %s2986_s28, %s2313_s3 }
 0x654   : > { %v1710_v49 = vpop.f32.mrb[11].mxu0 }
 0x675   : > { %v1003_v52 = vpop.f32.mrb[12].mxu0 }
 0x676   : > { %1124 = vrot.lane.b32.xlu1 %v1003_v52, %s2428_s30  ;;  %v1721_v53 = vpop.f32.mrb[13].mxu0  ;;  %s2314_s30 = scalar_lea.vmem %s2313_s3, 256 }
 0x677   : > { %v1006_v54 = vpop.f32.mrb[14].mxu0  ;;  %p2316_p8 = scmp.lt.s32.totalorder %s2314_s30, %s2308_s20 }
 0x678   : > { %v1722_v55 = vpop.f32.mrb[15].mxu0 }
 0x679   : > { %p2317_p5 = por %p2316_p8, %p2315_p12 }
 0x67b   : > { %p2318_p9 = pnand %p2317_p5, %p2311_p11 }
 0x67d   : > { %v1113_v56 = vpop.f32.mrb[16].mxu0 }
 0x67e   : > { %1128 = vrot.lane.b32.xlu0 %v1113_v56, %s2429_s12  ;;  %v1733_v57 = vpop.f32.mrb[17].mxu0 }
 0x67f   : > { %v1116_v58 = vpop.f32.mrb[18].mxu0 }
 0x680   : > { %v1734_v59 = vpop.f32.mrb[19].mxu0 }
 0x6c4   : > { %v1121_v60 = vpop.permute.xlu0 %1120 }
 0x6c5   : > { %v1131_v62 = vsel %vm680_vm2, %v782_v42, %v1121_v60 }
 0x6e8   : > { %v1125_v61 = vpop.permute.xlu1 %1124 }
 0x6e9   : > { %v1133_v63 = vsel %vm1132_vm4, %v1131_v62, %v1125_v61 }
 0x6f0   : > { %v1129_v1 = vpop.permute.xlu0 %1128 }
 0x6f1   : > { %v1135_v2 = vsel %vm1134_vm5, %v1133_v63, %v1129_v1 }
 0x6f2   : > { %v1136_v3 = vpack.c.bf16 %v1135_v2, %v1135_v2 }
 0x6f4   : > { %1740 = vmatmul.mubr.msk.bf16.vlgmr.msra.gmra.mrb[16].mxu1 %vm583_vm0, %v1136_v3 }
 0x6f5   : > { %1759 = vmatprep.mubr.msk.bf16.mxu1 %vm2415_vm1, %v2414_v5  ;;  %1752 = vmatpush3.bf16.msra.mxu1 %v1944_v31 }
 0x6f6   : > { %1753 = vmatprep.subr.bf16.mxu1 %v2414_v5 }
 0x6f9   : > { %1754 = vmatpush3.bf16.msra.mxu1 %v1945_v32 }
 0x6fa   : > { %1755 = vmatprep.subr.bf16.mxu1 %v2414_v5 }
 0x6fd   : > { %1756 = vmatpush3.bf16.msra.mxu1 %v1946_v33 }
 0x6fe   : > { %1757 = vmatprep.subr.bf16.mxu1 %v2414_v5 }
 0x701   : > { %1758 = vmatpush3.bf16.msra.mxu1 %v1947_v34 }
 0x7c7   : > { %v1197_v6 = vpop.f32.mrb[16].mxu1 }
 0x7c8   : > { %v1198_v7 = vadd.f32 %v1629_v4, %v1197_v6  ;;  %v1741_v8 = vpop.f32.mrb[17].mxu1 }
 0x7c9   : > { %v1200_v9 = vpop.f32.mrb[18].mxu1 }
 0x7ca   : > { %v2964_v10 = vadd.f32 %v1198_v7, %v2880_v0  ;;  %v1742_v11 = vpop.f32.mrb[19].mxu1 }
 0x7cc   : > { %v1206_v12 = vsel %vm583_vm0, %v2964_v10, 0.0  ;;  %v1210_v13 = vmul.f32 %v2964_v10, %v2964_v10 }
 0x7cd   : > { %1207 = vadd.xlane.f32.xlu1 %v1206_v12 }
 0x7ce   : > { %v1211_v14 = vsel %vm583_vm0, %v1210_v13, 0.0 }
 0x7cf   : > { %1212 = vadd.xlane.f32.xlu0 %v1211_v14 }
 0x85a   : > { %v1208_v17 = vpop.xlane.xlu1 %1207 }
 0x85b   : > { %v1209_v0 = vmul.f32 0.03125, %v1208_v17 }
 0x85c   : > { %v1213_v18 = vpop.xlane.xlu0 %1212 }
 0x85d   : > { %v1215_v19 = vmul.f32 %v1209_v0, %v1209_v0  ;;  %v1214_v20 = vmul.f32 0.03125, %v1213_v18  ;;  %v1217_v23 = vsub.f32 %v2964_v10, %v1209_v0 }
 0x85f   : > { %v1216_v21 = vsub.f32 %v1214_v20, %v1215_v19 }
 0x861   : > { %v1218_v22 = vadd.f32 1e-05, %v1216_v21 }
 0x863   : > { %1966 = vrsqrt.f32 %v1218_v22 }
 0x86d   : > { %v1967_v25 = vpop.eup %1966 }
 0x86e   : > { %v1220_v26 = vmul.f32 %v1967_v25, %v1217_v23 }
 0x870   : > { %v1227_v28 = vmul.f32 %v1633_v24, %v1220_v26 }
 0x872   : > { %v1234_v29 = vadd.f32 %v1634_v27, %v1227_v28 }
 0x874   : > { %v1235_v30 = vpack.c.bf16 %v1234_v29, %v1234_v29 }
 0x876   : > { %1748 = vmatmul.mubr.msk.bf16.vlgmr.msra.gmra.mrb[20].mxu0 %vm583_vm0, %v1235_v30 }
 0x949   : > { %v1296_v36 = vpop.f32.mrb[20].mxu0 }
 0x94a   : > { %v1297_v37 = vadd.f32 %v1635_v35, %v1296_v36  ;;  %v1749_v38 = vpop.f32.mrb[21].mxu0 }
 0x94b   : > { %v1299_v39 = vpop.f32.mrb[22].mxu0 }
 0x94c   : > { %v1302_v40 = vpack.c.bf16 %v1297_v37, %v1297_v37  ;;  %v1750_v41 = vpop.f32.mrb[23].mxu0 }
 0x94e   : > { %v1303_v42 = vmul.bf16 %v1302_v40, %v1302_v40 }
 0x950   : > { %v1304_v43 = vmul.bf16 %v1303_v42, %v1302_v40 }
 0x952   : > { %v1305_v44 = vmul.bf16 1027030327, %v1304_v43 }
 0x954   : > { %v1306_v45 = vadd.bf16 %v1305_v44, %v1302_v40 }
 0x956   : > { %v1307_v46 = vmul.bf16 1061961548, %v1306_v45 }
 0x958   : > { %1968 = vtanh.bf16 %v1307_v46 }
 0x963   : > { %v1969_v47 = vpop.eup %1968 }
 0x964   : > { %v1309_v48 = vadd.bf16 1065369472, %v1969_v47 }
 0x966   : > { %v1310_v5 = vmul.bf16 1056980736, %v1309_v48 }
 0x968   : > { %v1311_v49 = vmul.bf16 %v1310_v5, %v1302_v40 }
 0x96a   : > { %1760 = vmatmul.mubr.msk.bf16.vlgmr.msra.gmra.mrb[20].mxu1 %vm1351_vm6, %v1311_v49 }
 0xa3d   : > { %v1389_v51 = vpop.f32.mrb[20].mxu1 }
 0xa3e   : > { %v1390_v52 = vadd.f32 %v1639_v50, %v1389_v51  ;;  %v1761_v53 = vpop.f32.mrb[21].mxu1 }
 0xa3f   : > { %v1392_v54 = vpop.f32.mrb[22].mxu1 }
 0xa40   : > { %v1395_v55 = vadd.f32 %v1390_v52, %v2964_v10  ;;  %v1762_v56 = vpop.f32.mrb[23].mxu1 }
 0xa42   : > { %1396 = vst.msk [vmem:[%s574_s25] sm:$0xff] %vm583_vm0, %v1395_v55 }
 0xa43   : > { %2321 = shalt.err (!%p2318_p9)
}
 0xa44   : > { %s2322_s16 = scalar_lea.hbm %s2984_s17, 128  ;;  %s2326_s25 = scalar_lea.hbm %s3083_s1, 256 }
 0xa45   : > { %p2323_p7 = scmp.ne.s32.totalorder %s2984_s17, %s2322_s16  ;;  %p2327_p13 = scmp.lt.u32.totalorder %s2984_s17, %s3083_s1 }
 0xa46   : > { %p2328_p1 = scmp.lt.u32.totalorder %s2326_s25, %s2322_s16  ;;  %p2330_p2 = scmp.lt.u32.totalorder %s2322_s16, %s2984_s17 }
 0xa47   : > { %p2324_p10 = pnand %p2323_p7, %p3084_p0 }
 0xa48   : > { %p2329_p3 = por %p2328_p1, %p2327_p13 }
 0xa49   : > { %p2325_p4 = pneg %p2324_p10 }
 0xa4a   : > { %p2331_p6 = por %p2330_p2, %p2329_p3 }
 0xa4c   : > { %p2332_p11 = pnand %p2331_p6, %p2325_p4 }
 0xa4e   : > { %2335 = shalt.err (!%p2332_p11)
}
 0xa4f   : > { %1809 = dma.vmem_to_hbm [thread:$0]  (%p3084_p0), %s2986_s28, 128, %s2984_s17, %s1398_s27  }
 0xa50 PF: > { %s1423_s20 = sand.u32 1, %s2386_s21   ;;  %p3085_p12 = scmp.ne.s32.totalorder %s3067_s29, 0 }
 0xa51   : > { %p3086_p8 = scmp.ge.s32.totalorder %s2398_s24, 2  ;;  %s1424_s15 = scalar_lea.sflag [#allocation4], %s1423_s20 }
 0xa53   : > { %p1850_p5 = pnand %p3086_p8, %p3085_p12 }
 0xa55   : > { %2381 = dma.done.wait (!%p1850_p5), %s1424_s15, 128  }
 0xa56   : > { %2383 = vsyncadd (!%p1850_p5), %s1424_s15, 4294967168  ;;  %p31_p9 = scmp.ge.s32.totalorder %s2776_s13, 4   ;;  %s3087_s21 = smov %s2390_s22 }
 0xa57   : > { %s3088_s22 = smov %s2394_s23  ;;  %s3089_s23 = smov %s2788_s2 }
 0xa58   : > { %s3090_s24 = smov %s2776_s13  ;;  %33 = sbr.rel (!%p31_p9) target bundleno = 16 (0x10), region = 157 }
 0xa5f   :  { %1429 = vsyncpa [#allocation3], 1 }
 0xa60   :  { %1431 = vsyncpa [#allocation3 + $0x1], 1 }
 0xa61   :  { %1432 = vsyncpa [#allocation6], 1 }
 0xa62   :  { %1433 = vsyncpa [#allocation9], 1 }
 0xa63   :  { %1434 = vsyncpa [#allocation12], 1 }
 0xa64   :  { %1435 = vsyncpa [#allocation15], 1 }
 0xa65   :  { %1436 = vsyncpa [#allocation18], 1 }
 0xa66   :  { %1437 = vsyncpa [#allocation21], 1 }
 0xa67   :  { %1438 = vsyncpa [#allocation4], 1 }
 0xa68   :  { %1440 = vsyncpa [#allocation4 + $0x1], 1 }

</bundles_post_ra>
